<compile_context>
chip_gen: v6e
topology: v6e:2x2x1
jax: 0.10.0
libtpu: 0.0.40
codegen_flags: <defaults>
</compile_context>

<pallas_src>
import math
from functools import partial

import jax
import jax.numpy as jnp
from jax import lax
from jax.experimental import pallas as pl
from jax.experimental.pallas import tpu as pltpu


_LOG_CLAMP = math.log(1e-6)
_MASK_FILL = -1000000.0
_LANE = 128


def moire_focus(adj, shift, width):
    # The `focus` callable handed to the PyTorch module: a Gaussian focus.
    return jnp.exp(-((adj - shift) ** 2) / (2.0 * width ** 2))


# ----------------------------- Pallas kernel -------------------------------

def _moire_attn_kernel(x_ref, w_ref, b_ref, adj_ref, mrow_ref, mcol_ref,
                       eu_ref, ev_ref, ea_ref,
                       shifts_ref, nhw_ref, selfw_ref,
                       o_ref, *, num_heads, head_dim, out_dim, inv_scale):
    bt, n, din = x_ref.shape
    e_pad = eu_ref.shape[2]

    # ---------------- head-invariant work, once per grid step ----------------
    # Fused QKV projection: flatten (bt, n) onto the MXU sublane axis.
    # TODO(synk): bf16 operands would run the MXU at native rate on v6e/v7x but
    # change the fp32 module numerics, so f32 is kept here.
    x2 = x_ref[...].reshape(bt * n, din)
    qkv = (jnp.dot(x2, w_ref[...], preferred_element_type=jnp.float32)
           + b_ref[...])                                    # (bt*n, 3*Dout)
    qkv = qkv.reshape(bt, n, 3 * out_dim)

    adj = adj_ref[...]                                      # (bt, n, n)

    row_ids = lax.broadcasted_iota(jnp.int32, (n, n), 0)
    col_ids = lax.broadcasted_iota(jnp.int32, (n, n), 1)
    eye = (row_ids == col_ids).astype(jnp.float32)          # (n, n)

    mask2d = (mcol_ref[...] * mrow_ref[...]) > 0.5          # (bt, n, n)

    # One-hot node/edge incidence (head-invariant, built once).  Padded edge
    # slots carry u = v = -1 and ea = 0 so they contribute nothing.
    node_ids = lax.broadcasted_iota(jnp.int32, (bt, n, e_pad), 1)
    u_onehot = (node_ids == eu_ref[...]).astype(jnp.float32)   # (bt, n, e_pad)
    v_onehot = (node_ids == ev_ref[...]).astype(jnp.float32)   # (bt, n, e_pad)

    # ------------------------------ per head --------------------------------
    for h in range(num_heads):                     # small static unroll (H)
        shift = shifts_ref[h]                      # SMEM scalar reads
        neg_half_inv_w2 = nhw_ref[h]               # host-precomputed -0.5/w^2
        self_w = selfw_ref[h]

        # Static lane slices of the fused QKV tile; 1/sqrt(hd) folded into Q.
        q = qkv[:, :, h * head_dim:(h + 1) * head_dim] * inv_scale
        k = qkv[:, :, out_dim + h * head_dim:
                out_dim + (h + 1) * head_dim]
        v = qkv[:, :, 2 * out_dim + h * head_dim:
                2 * out_dim + (h + 1) * head_dim]

        # Q.K^T without materializing k.T (contract on the last dims).
        scores = jnp.einsum("bnd,bmd->bnm", q, k,
                            preferred_element_type=jnp.float32)

        # Gaussian moire focus directly in log space (no exp->log round trip).
        d = adj - shift
        log_moire = jnp.maximum(d * d * neg_half_inv_w2, _LOG_CLAMP)

        # Sparse edge-attribute scatter as an MXU matmul:
        #   bias[b,i,j] = sum_e ea[b,h,e] * [u_e == i] * [v_e == j]
        # TODO(synk): torch advanced-index `+=` does not accumulate duplicate
        # (u, v) pairs; this formulation would. Edges are assumed unique.
        scaled_u = u_onehot * ea_ref[:, h:h + 1, :]            # (bt, n, e_pad)
        edge_bias = jnp.einsum("bne,bme->bnm", scaled_u, v_onehot,
                               preferred_element_type=jnp.float32)

        adjusted = scores + log_moire + edge_bias + self_w * eye
        adjusted = jnp.where(mask2d, adjusted, _MASK_FILL)

        mx = jnp.max(adjusted, axis=-1, keepdims=True)
        p = jnp.exp(adjusted - mx)
        l = jnp.sum(p, axis=-1, keepdims=True)

        # Normalize after the PV matmul: O(N) reciprocals instead of O(N^2).
        out_h = jnp.einsum("bnm,bmd->bnd", p, v,
                           preferred_element_type=jnp.float32) * (1.0 / l)

        # Per-head store into the output lane slice; retires this head's vregs.
        o_ref[:, :, h * head_dim:(h + 1) * head_dim] = out_h.astype(o_ref.dtype)


def _pick_batch_tile(batch, max_bt=8):
    for bt in range(min(batch, max_bt), 0, -1):
        if batch % bt == 0:
            return bt
    return 1


def moire_attention_core(x, w_qkv, b_qkv, adj, mrow, mcol, eu, ev, ea,
                         shifts, neg_half_inv_w2, self_loop_w, *,
                         num_heads, head_dim, scale, batch_tile=None):
    B, N, Din = x.shape
    Dout = num_heads * head_dim
    E_pad = eu.shape[-1]
    bt = batch_tile if batch_tile is not None else _pick_batch_tile(B)
    assert B % bt == 0

    kern = partial(_moire_attn_kernel, num_heads=num_heads, head_dim=head_dim,
                   out_dim=Dout, inv_scale=1.0 / scale)
    return pl.pallas_call(
        kern,
        out_shape=jax.ShapeDtypeStruct((B, N, Dout), jnp.float32),
        grid=(B // bt,),
        in_specs=[
            pl.BlockSpec((bt, N, Din), lambda bi: (bi, 0, 0)),          # x
            # TODO(synk): single-buffer this grid-invariant weight (second
            # pipeline buffer is VMEM waste) once that is needed at real sizes.
            pl.BlockSpec((Din, 3 * Dout), lambda bi: (0, 0)),           # w_qkv
            pl.BlockSpec((1, 3 * Dout), lambda bi: (0, 0)),             # b_qkv
            pl.BlockSpec((bt, N, N), lambda bi: (bi, 0, 0)),            # adj
            pl.BlockSpec((bt, 1, N), lambda bi: (bi, 0, 0)),            # mask row
            pl.BlockSpec((bt, N, 1), lambda bi: (bi, 0, 0)),            # mask col
            pl.BlockSpec((bt, 1, E_pad), lambda bi: (bi, 0, 0)),        # edge u
            pl.BlockSpec((bt, 1, E_pad), lambda bi: (bi, 0, 0)),        # edge v
            pl.BlockSpec((bt, num_heads, E_pad), lambda bi: (bi, 0, 0)),  # edge attr
            pl.BlockSpec(memory_space=pltpu.SMEM),                      # shifts (H,)
            pl.BlockSpec(memory_space=pltpu.SMEM),                      # -0.5/w^2 (H,)
            pl.BlockSpec(memory_space=pltpu.SMEM),                      # self_w (H,)
        ],
        out_specs=pl.BlockSpec((bt, N, Dout), lambda bi: (bi, 0, 0)),
        compiler_params=pltpu.CompilerParams(
            dimension_semantics=("parallel",),       # shards over v7x's 2 TCs
            vmem_limit_bytes=32 * 1024 * 1024),
    )(x, w_qkv, b_qkv, adj, mrow, mcol, eu, ev, ea,
      shifts, neg_half_inv_w2, self_loop_w)


# ----------------------------- glue / params -------------------------------

def edge_ffn_apply(e, p):
    # FFN in eval mode: GaussianNoise and Dropout are identity.
    h = jnp.maximum(e @ p["w1"] + p["b1"], 0.0)
    return h @ p["w2"] + p["b2"]


def init_params(key, input_dim, output_dim, num_heads, edge_attr_dim):
    head_dim = output_dim // num_heads
    assert head_dim * num_heads == output_dim
    ks = jax.random.split(key, 8)
    s_q = 1.0 / math.sqrt(input_dim)
    s_e = 1.0 / math.sqrt(edge_attr_dim)
    return dict(
        num_heads=num_heads,
        head_dim=head_dim,
        scale2=math.sqrt(head_dim),
        w_qkv=jax.random.uniform(ks[0], (input_dim, 3 * output_dim),
                                 jnp.float32, -s_q, s_q),
        b_qkv=jax.random.uniform(ks[1], (1, 3 * output_dim),
                                 jnp.float32, -s_q, s_q),
        edge_ffn=dict(
            w1=jax.random.uniform(ks[2], (edge_attr_dim, edge_attr_dim),
                                  jnp.float32, -s_e, s_e),
            b1=jax.random.uniform(ks[3], (edge_attr_dim,), jnp.float32, -s_e, s_e),
            w2=jax.random.uniform(ks[4], (edge_attr_dim, edge_attr_dim),
                                  jnp.float32, -s_e, s_e),
            b2=jax.random.uniform(ks[5], (edge_attr_dim,), jnp.float32, -s_e, s_e),
        ),
        shifts=jnp.linspace(0.0, 1.5, num_heads).astype(jnp.float32),
        widths=jnp.linspace(0.5, 2.0, num_heads).astype(jnp.float32),
        self_loop_w=(1.0 / head_dim
                     + jax.random.uniform(ks[6], (num_heads,), jnp.float32)),
    )


def moire_attention_forward(params, x, adj, edge_index, edge_attr, mask):
    B, N, _ = x.shape
    H, hd = params["num_heads"], params["head_dim"]
    E = edge_index.shape[-1]
    E_pad = max(_LANE, ((E + _LANE - 1) // _LANE) * _LANE)   # lane-aligned

    # tiny edge FFN applied twice (eval mode)
    ea = edge_ffn_apply(edge_ffn_apply(edge_attr, params["edge_ffn"]),
                        params["edge_ffn"])                  # (B, E, Ea)
    ea_dim = ea.shape[-1]
    if ea_dim == H:
        ea = jnp.transpose(ea, (0, 2, 1))                    # (B, H, E)
    elif ea_dim == 1:
        ea = jnp.broadcast_to(jnp.transpose(ea, (0, 2, 1)), (B, H, E))
    else:
        # TODO(synk): torch else-branch calls self.edge_mapping which is not
        # defined in the original module; unsupported here.
        raise NotImplementedError("edge_attr_dim must be num_heads or 1")
    ea = jnp.pad(ea, ((0, 0), (0, 0), (0, E_pad - E)))       # zero-pad edges

    eu = edge_index[:, 0, :].astype(jnp.int32)               # (B, E)
    ev = edge_index[:, 1, :].astype(jnp.int32)
    eu = jnp.pad(eu, ((0, 0), (0, E_pad - E)),
                 constant_values=-1).reshape(B, 1, E_pad)    # -1 never matches
    ev = jnp.pad(ev, ((0, 0), (0, E_pad - E)),
                 constant_values=-1).reshape(B, 1, E_pad)

    maskf = mask.astype(jnp.float32)
    mrow = maskf.reshape(B, 1, N)
    mcol = maskf.reshape(B, N, 1)

    neg_half_inv_w2 = -0.5 / (params["widths"] ** 2)         # host-side consts

    return moire_attention_core(
        x, params["w_qkv"], params["b_qkv"], adj, mrow, mcol, eu, ev, ea,
        params["shifts"], neg_half_inv_w2, params["self_loop_w"],
        num_heads=H, head_dim=hd, scale=params["scale2"])


def reference_forward(params, x, adj, edge_index, edge_attr, mask):
    # pure-JAX reference of the original PyTorch math, for correctness checks
    B, N, _ = x.shape
    H, hd = params["num_heads"], params["head_dim"]
    hp = lax.Precision.HIGHEST
    qkv = (jnp.einsum("bni,io->bno", x, params["w_qkv"], precision=hp)
           + params["b_qkv"]).reshape(B, N, 3, H, hd)
    qkv = qkv.transpose(2, 0, 3, 1, 4)
    Q, K, V = qkv[0], qkv[1], qkv[2]
    ea = edge_ffn_apply(edge_ffn_apply(edge_attr, params["edge_ffn"]),
                        params["edge_ffn"])
    ea = jnp.transpose(ea, (0, 2, 1))
    scores = jnp.einsum("bhnd,bhmd->bhnm", Q, K, precision=hp) / params["scale2"]
    moire = jnp.maximum(moire_focus(adj[:, None],
                                    params["shifts"][None, :, None, None],
                                    params["widths"][None, :, None, None]), 1e-6)
    adj_s = scores + jnp.log(moire)
    E = edge_index.shape[-1]
    u = jnp.broadcast_to(edge_index[:, 0, :][:, None, :], (B, H, E))
    v = jnp.broadcast_to(edge_index[:, 1, :][:, None, :], (B, H, E))
    b_idx = jnp.broadcast_to(jnp.arange(B)[:, None, None], (B, H, E))
    h_idx = jnp.broadcast_to(jnp.arange(H)[None, :, None], (B, H, E))
    adj_s = adj_s.at[b_idx, h_idx, u, v].add(ea)
    adj_s = adj_s + jnp.eye(N)[None, None] * params["self_loop_w"][None, :, None, None]
    m2 = mask[:, None, :] & mask[:, :, None]
    adj_s = jnp.where(m2[:, None], adj_s, _MASK_FILL)
    w = jax.nn.softmax(adj_s, axis=-1)
    out = jnp.einsum("bhnm,bhmd->bhnd", w, V, precision=hp)
    return out.transpose(0, 2, 1, 3).reshape(B, N, H * hd)


if __name__ == "__main__":
    B, N, Din, Dout, H, Ea, E = 2, 16, 32, 32, 4, 4, 8   # edge_attr_dim == num_heads

    key = jax.random.PRNGKey(0)
    kx, ka, ke, kp = jax.random.split(key, 4)
    x = jax.random.normal(kx, (B, N, Din), jnp.float32)
    adj = jax.random.uniform(ka, (B, N, N), jnp.float32)
    edge_attr = jax.random.normal(ke, (B, E, Ea), jnp.float32)

    # unique (u, v) pairs per batch
    u = jnp.arange(E, dtype=jnp.int32) % N
    v = (3 * jnp.arange(E, dtype=jnp.int32) + 1) % N
    edge_index = jnp.broadcast_to(jnp.stack([u, v])[None], (B, 2, E)).astype(jnp.int32)

    mask = jnp.ones((B, N), dtype=bool).at[1, N - 3:].set(False)

    params = init_params(kp, Din, Dout, H, Ea)

    out = moire_attention_forward(params, x, adj, edge_index, edge_attr, mask)
    out = jax.block_until_ready(out)

    ref = reference_forward(params, x, adj, edge_index, edge_attr, mask)
    assert out.shape == (B, N, Dout)
    max_err = float(jnp.max(jnp.abs(out - ref)))
    assert jnp.allclose(out, ref, atol=1e-4, rtol=1e-4), \
        f"mismatch vs reference (max abs err {max_err})"

    print("KERNEL_OK")
</pallas_src>

<mosaic_0001>
module attributes {stable_mosaic.version = 11 : i64} {
  func.func @_moire_attn_kernel(%arg0: i32, %arg1: memref<2x16x32xf32, #tpu.memory_space<vmem>>, %arg2: memref<32x96xf32, #tpu.memory_space<vmem>>, %arg3: memref<1x96xf32, #tpu.memory_space<vmem>>, %arg4: memref<2x16x16xf32, #tpu.memory_space<vmem>>, %arg5: memref<2x1x16xf32, #tpu.memory_space<vmem>>, %arg6: memref<2x16x1xf32, #tpu.memory_space<vmem>>, %arg7: memref<2x1x128xi32, #tpu.memory_space<vmem>>, %arg8: memref<2x1x128xi32, #tpu.memory_space<vmem>>, %arg9: memref<2x4x128xf32, #tpu.memory_space<vmem>>, %arg10: memref<4xf32, #tpu.memory_space<smem>>, %arg11: memref<4xf32, #tpu.memory_space<smem>>, %arg12: memref<4xf32, #tpu.memory_space<smem>>, %arg13: memref<2x16x32xf32, #tpu.memory_space<vmem>>) attributes {dimension_semantics = [#tpu.dimension_semantics<parallel>], iteration_bounds = array<i64: 1>, scalar_prefetch = 0 : i64, scratch_operands = 0 : i64, tpu.core_type = #tpu.core_type<tc>, window_params = [{transform_indices = @transform_0, window_bounds = array<i64: 2, 16, 32>}, {pipeline_mode = #tpu.pipeline_mode<synchronous>, transform_indices = @transform_1, window_bounds = array<i64: 32, 96>}, {pipeline_mode = #tpu.pipeline_mode<synchronous>, transform_indices = @transform_2, window_bounds = array<i64: 1, 96>}, {transform_indices = @transform_3, window_bounds = array<i64: 2, 16, 16>}, {transform_indices = @transform_4, window_bounds = array<i64: 2, 1, 16>}, {transform_indices = @transform_5, window_bounds = array<i64: 2, 16, 1>}, {transform_indices = @transform_6, window_bounds = array<i64: 2, 1, 128>}, {transform_indices = @transform_7, window_bounds = array<i64: 2, 1, 128>}, {transform_indices = @transform_8, window_bounds = array<i64: 2, 4, 128>}, {transform_indices = @transform_9, window_bounds = array<i64: 4>}, {transform_indices = @transform_10, window_bounds = array<i64: 4>}, {transform_indices = @transform_11, window_bounds = array<i64: 4>}, {transform_indices = @transform_12, window_bounds = array<i64: 2, 16, 32>}]} {
    %c0 = arith.constant 0 : index
    %c0_0 = arith.constant 0 : index
    %c0_1 = arith.constant 0 : index
    %0 = vector.load %arg1[%c0, %c0_0, %c0_1] : memref<2x16x32xf32, #tpu.memory_space<vmem>>, vector<2x16x32xf32>
    %1 = vector.shape_cast %0 : vector<2x16x32xf32> to vector<32x32xf32>
    %c0_2 = arith.constant 0 : index
    %c0_3 = arith.constant 0 : index
    %2 = vector.load %arg2[%c0_2, %c0_3] : memref<32x96xf32, #tpu.memory_space<vmem>>, vector<32x96xf32>
    %cst = arith.constant dense<0.000000e+00> : vector<32x96xf32>
    %3 = tpu.matmul %1, %2, %cst {dimension_numbers = #tpu.dot_dimension_numbers<[1], [0], [0], [1], [0, 0, 1, 1], [], []>} : vector<32x32xf32>, vector<32x96xf32>, vector<32x96xf32> -> vector<32x96xf32>
    %c0_4 = arith.constant 0 : index
    %c0_5 = arith.constant 0 : index
    %4 = vector.load %arg3[%c0_4, %c0_5] : memref<1x96xf32, #tpu.memory_space<vmem>>, vector<1x96xf32>
    %5 = vector.broadcast %4 : vector<1x96xf32> to vector<32x96xf32>
    %6 = arith.addf %3, %5 : vector<32x96xf32>
    %7 = vector.shape_cast %6 : vector<32x96xf32> to vector<2x16x96xf32>
    %c0_6 = arith.constant 0 : index
    %c0_7 = arith.constant 0 : index
    %c0_8 = arith.constant 0 : index
    %8 = vector.load %arg4[%c0_6, %c0_7, %c0_8] : memref<2x16x16xf32, #tpu.memory_space<vmem>>, vector<2x16x16xf32>
    %9 = tpu.iota {dimensions = array<i32: 0>} : vector<16x16xi32>
    %10 = tpu.iota {dimensions = array<i32: 1>} : vector<16x16xi32>
    %11 = arith.cmpi eq, %9, %10 : vector<16x16xi32>
    %12 = arith.extui %11 : vector<16x16xi1> to vector<16x16xi32>
    %13 = arith.sitofp %12 : vector<16x16xi32> to vector<16x16xf32>
    %c0_9 = arith.constant 0 : index
    %c0_10 = arith.constant 0 : index
    %c0_11 = arith.constant 0 : index
    %14 = vector.load %arg6[%c0_9, %c0_10, %c0_11] : memref<2x16x1xf32, #tpu.memory_space<vmem>>, vector<2x16x1xf32>
    %c0_12 = arith.constant 0 : index
    %c0_13 = arith.constant 0 : index
    %c0_14 = arith.constant 0 : index
    %15 = vector.load %arg5[%c0_12, %c0_13, %c0_14] : memref<2x1x16xf32, #tpu.memory_space<vmem>>, vector<2x1x16xf32>
    %16 = vector.broadcast %14 : vector<2x16x1xf32> to vector<2x16x16xf32>
    %17 = vector.broadcast %15 : vector<2x1x16xf32> to vector<2x16x16xf32>
    %18 = arith.mulf %16, %17 : vector<2x16x16xf32>
    %cst_15 = arith.constant 5.000000e-01 : f32
    %19 = vector.broadcast %cst_15 : f32 to vector<2x16x16xf32>
    %20 = arith.cmpf ogt, %18, %19 : vector<2x16x16xf32>
    %21 = tpu.iota {dimensions = array<i32: 1>} : vector<2x16x128xi32>
    %c0_16 = arith.constant 0 : index
    %c0_17 = arith.constant 0 : index
    %c0_18 = arith.constant 0 : index
    %22 = vector.load %arg7[%c0_16, %c0_17, %c0_18] : memref<2x1x128xi32, #tpu.memory_space<vmem>>, vector<2x1x128xi32>
    %23 = vector.broadcast %22 : vector<2x1x128xi32> to vector<2x16x128xi32>
    %24 = arith.cmpi eq, %21, %23 : vector<2x16x128xi32>
    %25 = arith.extui %24 : vector<2x16x128xi1> to vector<2x16x128xi32>
    %26 = arith.sitofp %25 : vector<2x16x128xi32> to vector<2x16x128xf32>
    %c0_19 = arith.constant 0 : index
    %c0_20 = arith.constant 0 : index
    %c0_21 = arith.constant 0 : index
    %27 = vector.load %arg8[%c0_19, %c0_20, %c0_21] : memref<2x1x128xi32, #tpu.memory_space<vmem>>, vector<2x1x128xi32>
    %28 = vector.broadcast %27 : vector<2x1x128xi32> to vector<2x16x128xi32>
    %29 = arith.cmpi eq, %21, %28 : vector<2x16x128xi32>
    %30 = arith.extui %29 : vector<2x16x128xi1> to vector<2x16x128xi32>
    %31 = arith.sitofp %30 : vector<2x16x128xi32> to vector<2x16x128xf32>
    %c0_22 = arith.constant 0 : index
    %32 = memref.load %arg10[%c0_22] : memref<4xf32, #tpu.memory_space<smem>>
    %c0_23 = arith.constant 0 : index
    %33 = memref.load %arg11[%c0_23] : memref<4xf32, #tpu.memory_space<smem>>
    %c0_24 = arith.constant 0 : index
    %34 = memref.load %arg12[%c0_24] : memref<4xf32, #tpu.memory_space<smem>>
    %35 = vector.extract_strided_slice %7 {offsets = [0, 0, 0], sizes = [2, 16, 8], strides = [1, 1, 1]} : vector<2x16x96xf32> to vector<2x16x8xf32>
    %cst_25 = arith.constant 0.353553385 : f32
    %36 = vector.broadcast %cst_25 : f32 to vector<2x16x8xf32>
    %37 = arith.mulf %35, %36 : vector<2x16x8xf32>
    %38 = vector.extract_strided_slice %7 {offsets = [0, 0, 32], sizes = [2, 16, 8], strides = [1, 1, 1]} : vector<2x16x96xf32> to vector<2x16x8xf32>
    %39 = vector.extract_strided_slice %7 {offsets = [0, 0, 64], sizes = [2, 16, 8], strides = [1, 1, 1]} : vector<2x16x96xf32> to vector<2x16x8xf32>
    "tpu.trace_start"() <{level = 10 : i32, message = "bnd,bmd->bnm"}> : () -> ()
    %cst_26 = arith.constant dense<0.000000e+00> : vector<2x16x16xf32>
    %40 = tpu.matmul %37, %38, %cst_26 {dimension_numbers = #tpu.dot_dimension_numbers<[2], [2], [1], [1], [0, 0, 0, 1, 1, 1], [0], [0]>} : vector<2x16x8xf32>, vector<2x16x8xf32>, vector<2x16x16xf32> -> vector<2x16x16xf32>
    "tpu.trace_stop"() : () -> ()
    %41 = vector.broadcast %32 : f32 to vector<2x16x16xf32>
    %42 = arith.subf %8, %41 : vector<2x16x16xf32>
    %43 = arith.mulf %42, %42 : vector<2x16x16xf32>
    %44 = vector.broadcast %33 : f32 to vector<2x16x16xf32>
    %45 = arith.mulf %43, %44 : vector<2x16x16xf32>
    %cst_27 = arith.constant -13.8155107 : f32
    %46 = vector.broadcast %cst_27 : f32 to vector<2x16x16xf32>
    %47 = arith.maximumf %45, %46 : vector<2x16x16xf32>
    %c0_28 = arith.constant 0 : index
    %c0_29 = arith.constant 0 : index
    %c0_30 = arith.constant 0 : index
    %48 = vector.load %arg9[%c0_28, %c0_29, %c0_30] : memref<2x4x128xf32, #tpu.memory_space<vmem>>, vector<2x1x128xf32>
    %49 = vector.broadcast %48 : vector<2x1x128xf32> to vector<2x16x128xf32>
    %50 = arith.mulf %26, %49 : vector<2x16x128xf32>
    "tpu.trace_start"() <{level = 10 : i32, message = "bne,bme->bnm"}> : () -> ()
    %cst_31 = arith.constant dense<0.000000e+00> : vector<2x16x16xf32>
    %51 = tpu.matmul %50, %31, %cst_31 {dimension_numbers = #tpu.dot_dimension_numbers<[2], [2], [1], [1], [0, 0, 0, 1, 1, 1], [0], [0]>} : vector<2x16x128xf32>, vector<2x16x128xf32>, vector<2x16x16xf32> -> vector<2x16x16xf32>
    "tpu.trace_stop"() : () -> ()
    %52 = arith.addf %40, %47 : vector<2x16x16xf32>
    %53 = arith.addf %52, %51 : vector<2x16x16xf32>
    %54 = vector.broadcast %34 : f32 to vector<16x16xf32>
    %55 = arith.mulf %54, %13 : vector<16x16xf32>
    %56 = vector.shape_cast %55 : vector<16x16xf32> to vector<1x16x16xf32>
    %57 = vector.broadcast %56 : vector<1x16x16xf32> to vector<2x16x16xf32>
    %58 = arith.addf %53, %57 : vector<2x16x16xf32>
    %cst_32 = arith.constant -1.000000e+06 : f32
    %59 = vector.broadcast %cst_32 : f32 to vector<2x16x16xf32>
    %60 = arith.select %20, %58, %59 : vector<2x16x16xi1>, vector<2x16x16xf32>
    %cst_33 = arith.constant dense<0xFF800000> : vector<2x16xf32>
    %61 = vector.multi_reduction <maximumf>, %60, %cst_33 [2] : vector<2x16x16xf32> to vector<2x16xf32>
    %62 = vector.shape_cast %61 : vector<2x16xf32> to vector<2x16x1xf32>
    %63 = vector.broadcast %62 : vector<2x16x1xf32> to vector<2x16x16xf32>
    %64 = arith.subf %60, %63 : vector<2x16x16xf32>
    %65 = math.exp %64 : vector<2x16x16xf32>
    %cst_34 = arith.constant dense<0.000000e+00> : vector<2x16xf32>
    %66 = vector.multi_reduction <add>, %65, %cst_34 [2] : vector<2x16x16xf32> to vector<2x16xf32>
    %67 = vector.shape_cast %66 : vector<2x16xf32> to vector<2x16x1xf32>
    "tpu.trace_start"() <{level = 10 : i32, message = "bnm,bmd->bnd"}> : () -> ()
    %cst_35 = arith.constant dense<0.000000e+00> : vector<2x16x8xf32>
    %68 = tpu.matmul %65, %39, %cst_35 {dimension_numbers = #tpu.dot_dimension_numbers<[2], [1], [1], [2], [0, 0, 0, 1, 1, 2], [0], [0]>} : vector<2x16x16xf32>, vector<2x16x8xf32>, vector<2x16x8xf32> -> vector<2x16x8xf32>
    "tpu.trace_stop"() : () -> ()
    %cst_36 = arith.constant 1.000000e+00 : f32
    %69 = vector.broadcast %cst_36 : f32 to vector<2x16x1xf32>
    %70 = arith.divf %69, %67 : vector<2x16x1xf32>
    %71 = vector.broadcast %70 : vector<2x16x1xf32> to vector<2x16x8xf32>
    %72 = arith.mulf %68, %71 : vector<2x16x8xf32>
    %c0_37 = arith.constant 0 : index
    %c0_38 = arith.constant 0 : index
    %c0_39 = arith.constant 0 : index
    %73 = vector.load %arg13[%c0_37, %c0_38, %c0_39] : memref<2x16x32xf32, #tpu.memory_space<vmem>>, vector<2x16x8xf32>
    tpu.vector_store %arg13[%c0_37, %c0_38, %c0_39], %72 {strides = array<i32>} : memref<2x16x32xf32, #tpu.memory_space<vmem>>, vector<2x16x8xf32>,
    %c1 = arith.constant 1 : index
    %74 = memref.load %arg10[%c1] : memref<4xf32, #tpu.memory_space<smem>>
    %c1_40 = arith.constant 1 : index
    %75 = memref.load %arg11[%c1_40] : memref<4xf32, #tpu.memory_space<smem>>
    %c1_41 = arith.constant 1 : index
    %76 = memref.load %arg12[%c1_41] : memref<4xf32, #tpu.memory_space<smem>>
    %77 = vector.extract_strided_slice %7 {offsets = [0, 0, 8], sizes = [2, 16, 8], strides = [1, 1, 1]} : vector<2x16x96xf32> to vector<2x16x8xf32>
    %cst_42 = arith.constant 0.353553385 : f32
    %78 = vector.broadcast %cst_42 : f32 to vector<2x16x8xf32>
    %79 = arith.mulf %77, %78 : vector<2x16x8xf32>
    %80 = vector.extract_strided_slice %7 {offsets = [0, 0, 40], sizes = [2, 16, 8], strides = [1, 1, 1]} : vector<2x16x96xf32> to vector<2x16x8xf32>
    %81 = vector.extract_strided_slice %7 {offsets = [0, 0, 72], sizes = [2, 16, 8], strides = [1, 1, 1]} : vector<2x16x96xf32> to vector<2x16x8xf32>
    "tpu.trace_start"() <{level = 10 : i32, message = "bnd,bmd->bnm"}> : () -> ()
    %cst_43 = arith.constant dense<0.000000e+00> : vector<2x16x16xf32>
    %82 = tpu.matmul %79, %80, %cst_43 {dimension_numbers = #tpu.dot_dimension_numbers<[2], [2], [1], [1], [0, 0, 0, 1, 1, 1], [0], [0]>} : vector<2x16x8xf32>, vector<2x16x8xf32>, vector<2x16x16xf32> -> vector<2x16x16xf32>
    "tpu.trace_stop"() : () -> ()
    %83 = vector.broadcast %74 : f32 to vector<2x16x16xf32>
    %84 = arith.subf %8, %83 : vector<2x16x16xf32>
    %85 = arith.mulf %84, %84 : vector<2x16x16xf32>
    %86 = vector.broadcast %75 : f32 to vector<2x16x16xf32>
    %87 = arith.mulf %85, %86 : vector<2x16x16xf32>
    %cst_44 = arith.constant -13.8155107 : f32
    %88 = vector.broadcast %cst_44 : f32 to vector<2x16x16xf32>
    %89 = arith.maximumf %87, %88 : vector<2x16x16xf32>
    %c0_45 = arith.constant 0 : index
    %c1_46 = arith.constant 1 : index
    %c0_47 = arith.constant 0 : index
    %90 = vector.load %arg9[%c0_45, %c1_46, %c0_47] : memref<2x4x128xf32, #tpu.memory_space<vmem>>, vector<2x1x128xf32>
    %91 = vector.broadcast %90 : vector<2x1x128xf32> to vector<2x16x128xf32>
    %92 = arith.mulf %26, %91 : vector<2x16x128xf32>
    "tpu.trace_start"() <{level = 10 : i32, message = "bne,bme->bnm"}> : () -> ()
    %cst_48 = arith.constant dense<0.000000e+00> : vector<2x16x16xf32>
    %93 = tpu.matmul %92, %31, %cst_48 {dimension_numbers = #tpu.dot_dimension_numbers<[2], [2], [1], [1], [0, 0, 0, 1, 1, 1], [0], [0]>} : vector<2x16x128xf32>, vector<2x16x128xf32>, vector<2x16x16xf32> -> vector<2x16x16xf32>
    "tpu.trace_stop"() : () -> ()
    %94 = arith.addf %82, %89 : vector<2x16x16xf32>
    %95 = arith.addf %94, %93 : vector<2x16x16xf32>
    %96 = vector.broadcast %76 : f32 to vector<16x16xf32>
    %97 = arith.mulf %96, %13 : vector<16x16xf32>
    %98 = vector.shape_cast %97 : vector<16x16xf32> to vector<1x16x16xf32>
    %99 = vector.broadcast %98 : vector<1x16x16xf32> to vector<2x16x16xf32>
    %100 = arith.addf %95, %99 : vector<2x16x16xf32>
    %cst_49 = arith.constant -1.000000e+06 : f32
    %101 = vector.broadcast %cst_49 : f32 to vector<2x16x16xf32>
    %102 = arith.select %20, %100, %101 : vector<2x16x16xi1>, vector<2x16x16xf32>
    %cst_50 = arith.constant dense<0xFF800000> : vector<2x16xf32>
    %103 = vector.multi_reduction <maximumf>, %102, %cst_50 [2] : vector<2x16x16xf32> to vector<2x16xf32>
    %104 = vector.shape_cast %103 : vector<2x16xf32> to vector<2x16x1xf32>
    %105 = vector.broadcast %104 : vector<2x16x1xf32> to vector<2x16x16xf32>
    %106 = arith.subf %102, %105 : vector<2x16x16xf32>
    %107 = math.exp %106 : vector<2x16x16xf32>
    %cst_51 = arith.constant dense<0.000000e+00> : vector<2x16xf32>
    %108 = vector.multi_reduction <add>, %107, %cst_51 [2] : vector<2x16x16xf32> to vector<2x16xf32>
    %109 = vector.shape_cast %108 : vector<2x16xf32> to vector<2x16x1xf32>
    "tpu.trace_start"() <{level = 10 : i32, message = "bnm,bmd->bnd"}> : () -> ()
    %cst_52 = arith.constant dense<0.000000e+00> : vector<2x16x8xf32>
    %110 = tpu.matmul %107, %81, %cst_52 {dimension_numbers = #tpu.dot_dimension_numbers<[2], [1], [1], [2], [0, 0, 0, 1, 1, 2], [0], [0]>} : vector<2x16x16xf32>, vector<2x16x8xf32>, vector<2x16x8xf32> -> vector<2x16x8xf32>
    "tpu.trace_stop"() : () -> ()
    %cst_53 = arith.constant 1.000000e+00 : f32
    %111 = vector.broadcast %cst_53 : f32 to vector<2x16x1xf32>
    %112 = arith.divf %111, %109 : vector<2x16x1xf32>
    %113 = vector.broadcast %112 : vector<2x16x1xf32> to vector<2x16x8xf32>
    %114 = arith.mulf %110, %113 : vector<2x16x8xf32>
    %c0_54 = arith.constant 0 : index
    %c0_55 = arith.constant 0 : index
    %c8 = arith.constant 8 : index
    %115 = vector.load %arg13[%c0_54, %c0_55, %c8] : memref<2x16x32xf32, #tpu.memory_space<vmem>>, vector<2x16x8xf32>
    tpu.vector_store %arg13[%c0_54, %c0_55, %c8], %114 {strides = array<i32>} : memref<2x16x32xf32, #tpu.memory_space<vmem>>, vector<2x16x8xf32>,
    %c2 = arith.constant 2 : index
    %116 = memref.load %arg10[%c2] : memref<4xf32, #tpu.memory_space<smem>>
    %c2_56 = arith.constant 2 : index
    %117 = memref.load %arg11[%c2_56] : memref<4xf32, #tpu.memory_space<smem>>
    %c2_57 = arith.constant 2 : index
    %118 = memref.load %arg12[%c2_57] : memref<4xf32, #tpu.memory_space<smem>>
    %119 = vector.extract_strided_slice %7 {offsets = [0, 0, 16], sizes = [2, 16, 8], strides = [1, 1, 1]} : vector<2x16x96xf32> to vector<2x16x8xf32>
    %cst_58 = arith.constant 0.353553385 : f32
    %120 = vector.broadcast %cst_58 : f32 to vector<2x16x8xf32>
    %121 = arith.mulf %119, %120 : vector<2x16x8xf32>
    %122 = vector.extract_strided_slice %7 {offsets = [0, 0, 48], sizes = [2, 16, 8], strides = [1, 1, 1]} : vector<2x16x96xf32> to vector<2x16x8xf32>
    %123 = vector.extract_strided_slice %7 {offsets = [0, 0, 80], sizes = [2, 16, 8], strides = [1, 1, 1]} : vector<2x16x96xf32> to vector<2x16x8xf32>
    "tpu.trace_start"() <{level = 10 : i32, message = "bnd,bmd->bnm"}> : () -> ()
    %cst_59 = arith.constant dense<0.000000e+00> : vector<2x16x16xf32>
    %124 = tpu.matmul %121, %122, %cst_59 {dimension_numbers = #tpu.dot_dimension_numbers<[2], [2], [1], [1], [0, 0, 0, 1, 1, 1], [0], [0]>} : vector<2x16x8xf32>, vector<2x16x8xf32>, vector<2x16x16xf32> -> vector<2x16x16xf32>
    "tpu.trace_stop"() : () -> ()
    %125 = vector.broadcast %116 : f32 to vector<2x16x16xf32>
    %126 = arith.subf %8, %125 : vector<2x16x16xf32>
    %127 = arith.mulf %126, %126 : vector<2x16x16xf32>
    %128 = vector.broadcast %117 : f32 to vector<2x16x16xf32>
    %129 = arith.mulf %127, %128 : vector<2x16x16xf32>
    %cst_60 = arith.constant -13.8155107 : f32
    %130 = vector.broadcast %cst_60 : f32 to vector<2x16x16xf32>
    %131 = arith.maximumf %129, %130 : vector<2x16x16xf32>
    %c0_61 = arith.constant 0 : index
    %c2_62 = arith.constant 2 : index
    %c0_63 = arith.constant 0 : index
    %132 = vector.load %arg9[%c0_61, %c2_62, %c0_63] : memref<2x4x128xf32, #tpu.memory_space<vmem>>, vector<2x1x128xf32>
    %133 = vector.broadcast %132 : vector<2x1x128xf32> to vector<2x16x128xf32>
    %134 = arith.mulf %26, %133 : vector<2x16x128xf32>
    "tpu.trace_start"() <{level = 10 : i32, message = "bne,bme->bnm"}> : () -> ()
    %cst_64 = arith.constant dense<0.000000e+00> : vector<2x16x16xf32>
    %135 = tpu.matmul %134, %31, %cst_64 {dimension_numbers = #tpu.dot_dimension_numbers<[2], [2], [1], [1], [0, 0, 0, 1, 1, 1], [0], [0]>} : vector<2x16x128xf32>, vector<2x16x128xf32>, vector<2x16x16xf32> -> vector<2x16x16xf32>
    "tpu.trace_stop"() : () -> ()
    %136 = arith.addf %124, %131 : vector<2x16x16xf32>
    %137 = arith.addf %136, %135 : vector<2x16x16xf32>
    %138 = vector.broadcast %118 : f32 to vector<16x16xf32>
    %139 = arith.mulf %138, %13 : vector<16x16xf32>
    %140 = vector.shape_cast %139 : vector<16x16xf32> to vector<1x16x16xf32>
    %141 = vector.broadcast %140 : vector<1x16x16xf32> to vector<2x16x16xf32>
    %142 = arith.addf %137, %141 : vector<2x16x16xf32>
    %cst_65 = arith.constant -1.000000e+06 : f32
    %143 = vector.broadcast %cst_65 : f32 to vector<2x16x16xf32>
    %144 = arith.select %20, %142, %143 : vector<2x16x16xi1>, vector<2x16x16xf32>
    %cst_66 = arith.constant dense<0xFF800000> : vector<2x16xf32>
    %145 = vector.multi_reduction <maximumf>, %144, %cst_66 [2] : vector<2x16x16xf32> to vector<2x16xf32>
    %146 = vector.shape_cast %145 : vector<2x16xf32> to vector<2x16x1xf32>
    %147 = vector.broadcast %146 : vector<2x16x1xf32> to vector<2x16x16xf32>
    %148 = arith.subf %144, %147 : vector<2x16x16xf32>
    %149 = math.exp %148 : vector<2x16x16xf32>
    %cst_67 = arith.constant dense<0.000000e+00> : vector<2x16xf32>
    %150 = vector.multi_reduction <add>, %149, %cst_67 [2] : vector<2x16x16xf32> to vector<2x16xf32>
    %151 = vector.shape_cast %150 : vector<2x16xf32> to vector<2x16x1xf32>
    "tpu.trace_start"() <{level = 10 : i32, message = "bnm,bmd->bnd"}> : () -> ()
    %cst_68 = arith.constant dense<0.000000e+00> : vector<2x16x8xf32>
    %152 = tpu.matmul %149, %123, %cst_68 {dimension_numbers = #tpu.dot_dimension_numbers<[2], [1], [1], [2], [0, 0, 0, 1, 1, 2], [0], [0]>} : vector<2x16x16xf32>, vector<2x16x8xf32>, vector<2x16x8xf32> -> vector<2x16x8xf32>
    "tpu.trace_stop"() : () -> ()
    %cst_69 = arith.constant 1.000000e+00 : f32
    %153 = vector.broadcast %cst_69 : f32 to vector<2x16x1xf32>
    %154 = arith.divf %153, %151 : vector<2x16x1xf32>
    %155 = vector.broadcast %154 : vector<2x16x1xf32> to vector<2x16x8xf32>
    %156 = arith.mulf %152, %155 : vector<2x16x8xf32>
    %c0_70 = arith.constant 0 : index
    %c0_71 = arith.constant 0 : index
    %c16 = arith.constant 16 : index
    %157 = vector.load %arg13[%c0_70, %c0_71, %c16] : memref<2x16x32xf32, #tpu.memory_space<vmem>>, vector<2x16x8xf32>
    tpu.vector_store %arg13[%c0_70, %c0_71, %c16], %156 {strides = array<i32>} : memref<2x16x32xf32, #tpu.memory_space<vmem>>, vector<2x16x8xf32>,
    %c3 = arith.constant 3 : index
    %158 = memref.load %arg10[%c3] : memref<4xf32, #tpu.memory_space<smem>>
    %c3_72 = arith.constant 3 : index
    %159 = memref.load %arg11[%c3_72] : memref<4xf32, #tpu.memory_space<smem>>
    %c3_73 = arith.constant 3 : index
    %160 = memref.load %arg12[%c3_73] : memref<4xf32, #tpu.memory_space<smem>>
    %161 = vector.extract_strided_slice %7 {offsets = [0, 0, 24], sizes = [2, 16, 8], strides = [1, 1, 1]} : vector<2x16x96xf32> to vector<2x16x8xf32>
    %cst_74 = arith.constant 0.353553385 : f32
    %162 = vector.broadcast %cst_74 : f32 to vector<2x16x8xf32>
    %163 = arith.mulf %161, %162 : vector<2x16x8xf32>
    %164 = vector.extract_strided_slice %7 {offsets = [0, 0, 56], sizes = [2, 16, 8], strides = [1, 1, 1]} : vector<2x16x96xf32> to vector<2x16x8xf32>
    %165 = vector.extract_strided_slice %7 {offsets = [0, 0, 88], sizes = [2, 16, 8], strides = [1, 1, 1]} : vector<2x16x96xf32> to vector<2x16x8xf32>
    "tpu.trace_start"() <{level = 10 : i32, message = "bnd,bmd->bnm"}> : () -> ()
    %cst_75 = arith.constant dense<0.000000e+00> : vector<2x16x16xf32>
    %166 = tpu.matmul %163, %164, %cst_75 {dimension_numbers = #tpu.dot_dimension_numbers<[2], [2], [1], [1], [0, 0, 0, 1, 1, 1], [0], [0]>} : vector<2x16x8xf32>, vector<2x16x8xf32>, vector<2x16x16xf32> -> vector<2x16x16xf32>
    "tpu.trace_stop"() : () -> ()
    %167 = vector.broadcast %158 : f32 to vector<2x16x16xf32>
    %168 = arith.subf %8, %167 : vector<2x16x16xf32>
    %169 = arith.mulf %168, %168 : vector<2x16x16xf32>
    %170 = vector.broadcast %159 : f32 to vector<2x16x16xf32>
    %171 = arith.mulf %169, %170 : vector<2x16x16xf32>
    %cst_76 = arith.constant -13.8155107 : f32
    %172 = vector.broadcast %cst_76 : f32 to vector<2x16x16xf32>
    %173 = arith.maximumf %171, %172 : vector<2x16x16xf32>
    %c0_77 = arith.constant 0 : index
    %c3_78 = arith.constant 3 : index
    %c0_79 = arith.constant 0 : index
    %174 = vector.load %arg9[%c0_77, %c3_78, %c0_79] : memref<2x4x128xf32, #tpu.memory_space<vmem>>, vector<2x1x128xf32>
    %175 = vector.broadcast %174 : vector<2x1x128xf32> to vector<2x16x128xf32>
    %176 = arith.mulf %26, %175 : vector<2x16x128xf32>
    "tpu.trace_start"() <{level = 10 : i32, message = "bne,bme->bnm"}> : () -> ()
    %cst_80 = arith.constant dense<0.000000e+00> : vector<2x16x16xf32>
    %177 = tpu.matmul %176, %31, %cst_80 {dimension_numbers = #tpu.dot_dimension_numbers<[2], [2], [1], [1], [0, 0, 0, 1, 1, 1], [0], [0]>} : vector<2x16x128xf32>, vector<2x16x128xf32>, vector<2x16x16xf32> -> vector<2x16x16xf32>
    "tpu.trace_stop"() : () -> ()
    %178 = arith.addf %166, %173 : vector<2x16x16xf32>
    %179 = arith.addf %178, %177 : vector<2x16x16xf32>
    %180 = vector.broadcast %160 : f32 to vector<16x16xf32>
    %181 = arith.mulf %180, %13 : vector<16x16xf32>
    %182 = vector.shape_cast %181 : vector<16x16xf32> to vector<1x16x16xf32>
    %183 = vector.broadcast %182 : vector<1x16x16xf32> to vector<2x16x16xf32>
    %184 = arith.addf %179, %183 : vector<2x16x16xf32>
    %cst_81 = arith.constant -1.000000e+06 : f32
    %185 = vector.broadcast %cst_81 : f32 to vector<2x16x16xf32>
    %186 = arith.select %20, %184, %185 : vector<2x16x16xi1>, vector<2x16x16xf32>
    %cst_82 = arith.constant dense<0xFF800000> : vector<2x16xf32>
    %187 = vector.multi_reduction <maximumf>, %186, %cst_82 [2] : vector<2x16x16xf32> to vector<2x16xf32>
    %188 = vector.shape_cast %187 : vector<2x16xf32> to vector<2x16x1xf32>
    %189 = vector.broadcast %188 : vector<2x16x1xf32> to vector<2x16x16xf32>
    %190 = arith.subf %186, %189 : vector<2x16x16xf32>
    %191 = math.exp %190 : vector<2x16x16xf32>
    %cst_83 = arith.constant dense<0.000000e+00> : vector<2x16xf32>
    %192 = vector.multi_reduction <add>, %191, %cst_83 [2] : vector<2x16x16xf32> to vector<2x16xf32>
    %193 = vector.shape_cast %192 : vector<2x16xf32> to vector<2x16x1xf32>
    "tpu.trace_start"() <{level = 10 : i32, message = "bnm,bmd->bnd"}> : () -> ()
    %cst_84 = arith.constant dense<0.000000e+00> : vector<2x16x8xf32>
    %194 = tpu.matmul %191, %165, %cst_84 {dimension_numbers = #tpu.dot_dimension_numbers<[2], [1], [1], [2], [0, 0, 0, 1, 1, 2], [0], [0]>} : vector<2x16x16xf32>, vector<2x16x8xf32>, vector<2x16x8xf32> -> vector<2x16x8xf32>
    "tpu.trace_stop"() : () -> ()
    %cst_85 = arith.constant 1.000000e+00 : f32
    %195 = vector.broadcast %cst_85 : f32 to vector<2x16x1xf32>
    %196 = arith.divf %195, %193 : vector<2x16x1xf32>
    %197 = vector.broadcast %196 : vector<2x16x1xf32> to vector<2x16x8xf32>
    %198 = arith.mulf %194, %197 : vector<2x16x8xf32>
    %c0_86 = arith.constant 0 : index
    %c0_87 = arith.constant 0 : index
    %c24 = arith.constant 24 : index
    %199 = vector.load %arg13[%c0_86, %c0_87, %c24] : memref<2x16x32xf32, #tpu.memory_space<vmem>>, vector<2x16x8xf32>
    tpu.vector_store %arg13[%c0_86, %c0_87, %c24], %198 {strides = array<i32>} : memref<2x16x32xf32, #tpu.memory_space<vmem>>, vector<2x16x8xf32>,
    return
  }
  func.func @transform_0(%arg0: i32) -> (i32, i32, i32) {
    %c0_i32 = arith.constant 0 : i32
    %c0_i32_0 = arith.constant 0 : i32
    %c0_i32_1 = arith.constant 0 : i32
    return %arg0, %c0_i32, %c0_i32_0 : i32, i32, i32
  }
  func.func @transform_1(%arg0: i32) -> (i32, i32) {
    %c0_i32 = arith.constant 0 : i32
    %c0_i32_0 = arith.constant 0 : i32
    %c0_i32_1 = arith.constant 0 : i32
    return %c0_i32, %c0_i32_0 : i32, i32
  }
  func.func @transform_2(%arg0: i32) -> (i32, i32) {
    %c0_i32 = arith.constant 0 : i32
    %c0_i32_0 = arith.constant 0 : i32
    %c0_i32_1 = arith.constant 0 : i32
    return %c0_i32, %c0_i32_0 : i32, i32
  }
  func.func @transform_3(%arg0: i32) -> (i32, i32, i32) {
    %c0_i32 = arith.constant 0 : i32
    %c0_i32_0 = arith.constant 0 : i32
    %c0_i32_1 = arith.constant 0 : i32
    return %arg0, %c0_i32, %c0_i32_0 : i32, i32, i32
  }
  func.func @transform_4(%arg0: i32) -> (i32, i32, i32) {
    %c0_i32 = arith.constant 0 : i32
    %c0_i32_0 = arith.constant 0 : i32
    %c0_i32_1 = arith.constant 0 : i32
    return %arg0, %c0_i32, %c0_i32_0 : i32, i32, i32
  }
  func.func @transform_5(%arg0: i32) -> (i32, i32, i32) {
    %c0_i32 = arith.constant 0 : i32
    %c0_i32_0 = arith.constant 0 : i32
    %c0_i32_1 = arith.constant 0 : i32
    return %arg0, %c0_i32, %c0_i32_0 : i32, i32, i32
  }
  func.func @transform_6(%arg0: i32) -> (i32, i32, i32) {
    %c0_i32 = arith.constant 0 : i32
    %c0_i32_0 = arith.constant 0 : i32
    %c0_i32_1 = arith.constant 0 : i32
    return %arg0, %c0_i32, %c0_i32_0 : i32, i32, i32
  }
  func.func @transform_7(%arg0: i32) -> (i32, i32, i32) {
    %c0_i32 = arith.constant 0 : i32
    %c0_i32_0 = arith.constant 0 : i32
    %c0_i32_1 = arith.constant 0 : i32
    return %arg0, %c0_i32, %c0_i32_0 : i32, i32, i32
  }
  func.func @transform_8(%arg0: i32) -> (i32, i32, i32) {
    %c0_i32 = arith.constant 0 : i32
    %c0_i32_0 = arith.constant 0 : i32
    %c0_i32_1 = arith.constant 0 : i32
    return %arg0, %c0_i32, %c0_i32_0 : i32, i32, i32
  }
  func.func @transform_9(%arg0: i32) -> i32 {
    %c0_i32 = arith.constant 0 : i32
    %c0_i32_0 = arith.constant 0 : i32
    return %c0_i32 : i32
  }
  func.func @transform_10(%arg0: i32) -> i32 {
    %c0_i32 = arith.constant 0 : i32
    %c0_i32_0 = arith.constant 0 : i32
    return %c0_i32 : i32
  }
  func.func @transform_11(%arg0: i32) -> i32 {
    %c0_i32 = arith.constant 0 : i32
    %c0_i32_0 = arith.constant 0 : i32
    return %c0_i32 : i32
  }
  func.func @transform_12(%arg0: i32) -> (i32, i32, i32) {
    %c0_i32 = arith.constant 0 : i32
    %c0_i32_0 = arith.constant 0 : i32
    %c0_i32_1 = arith.constant 0 : i32
    return %arg0, %c0_i32, %c0_i32_0 : i32, i32, i32
  }
}

</mosaic_0001>

<bundles_post_ra>
// kernel: tpu_custom_call.1
= control target key start
LH: loop header
LB: loop body
LE: loop exit
PB: predicated region body
PF: predicated region fallthrough
CT: control target
= control target key end

     0   :  { %17 = vsyncpa [#allocation3], 0  ;;  %s4207_s0 = inlined_call_operand.vmem [shape: f32[2,16,32], index: 0, kind: input, shape index: {}]   ;;  %s4208_s1 = inlined_call_operand.hbm [shape: f32[32,96], index: 1, kind: input, shape index: {}]   ;;  %s4209_s2 = inlined_call_operand.hbm [shape: f32[1,96], index: 2, kind: input, shape index: {}]   ;;  %s4210_s3 = inlined_call_operand.hbm [shape: f32[2,16,16], index: 3, kind: input, shape index: {}]   ;;  %s4211_s4 = inlined_call_operand.hbm [shape: f32[2,1,16], index: 4, kind: input, shape index: {}]   ;;  %s4212_s5 = inlined_call_operand.vmem [shape: f32[2,16,1], index: 5, kind: input, shape index: {}]   ;;  %s4213_s6 = inlined_call_operand.vmem [shape: s32[2,1,128], index: 6, kind: input, shape index: {}]   ;;  %s4214_s7 = inlined_call_operand.vmem [shape: s32[2,1,128], index: 7, kind: input, shape index: {}]   ;;  %s4215_s8 = inlined_call_operand.vmem [shape: f32[2,4,128], index: 8, kind: input, shape index: {}]   ;;  %s4216_s9 = inlined_call_operand.vmem [shape: f32[4], index: 9, kind: input, shape index: {}]   ;;  %s4217_s10 = inlined_call_operand.vmem [shape: f32[4], index: 10, kind: input, shape index: {}]   ;;  %s4218_s11 = inlined_call_operand.vmem [shape: f32[4], index: 11, kind: input, shape index: {}]   ;;  %s4219_s12 = inlined_call_operand.hbm [shape: f32[2,16,32], index: 12, kind: output, shape index: {}]  }
   0x1   :  { %18 = vsyncpa [#allocation7], 0 }
   0x2   :  { %19 = vsyncpa [#allocation10], 0 }
   0x3   :  { %20 = vsyncpa [#allocation5], 0 }
   0x4   :  { %21 = vsyncpa [#allocation13], 0  ;;  %s95_s23 = sshll.u32 %s4217_s10, 4  ;;  %s96_s23 = int_to_ptr.vmem [resolvable:$true] %s95_s23 }
   0x5   :  { %22 = vsyncpa [#allocation4], 0  ;;  %s3488_s24 = smov [#allocation6]  }
   0x6   :  { %s43_s25 = sshll.u32 %s3488_s24, 4  ;;  %s44_s25 = int_to_ptr.vmem [resolvable:$true] %s43_s25 }
   0x7   :  { %s3348_s26 = scalar_lea.vmem %s44_s25, 16  ;;  %s3352_s27 = scalar_lea.vmem %s44_s25, 32 }
   0x8   :  { %p3349_p0 = scmp.ne.s32.totalorder %s44_s25, %s3348_s26  ;;  %p3353_p1 = scmp.lt.s32.totalorder %s44_s25, %s44_s25 }
   0x9   :  { %p3354_p2 = scmp.lt.s32.totalorder %s3352_s27, %s3348_s26 }
   0xb   :  { %p3355_p3 = por %p3354_p2, %p3353_p1 }
   0xd   :  { %p3356_p4 = pnand %p3355_p3, %p3349_p0 }
   0xf   :  { %3359 = shalt.err (!%p3356_p4)
}
  0x10   :  { %46 = dma.hbm_to_vmem [thread:$0]  %s4209_s2, 16, %s44_s25, [#allocation7]  }
  0x11   :  { %s3360_s30 = scalar_lea.vmem %s96_s23, 16  ;;  %p3365_p6 = scmp.lt.s32.totalorder %s96_s23, %s96_s23 }
  0x12   :  { %p3361_p5 = scmp.ne.s32.totalorder %s96_s23, %s3360_s30  ;;  %p3366_p7 = scmp.lt.s32.totalorder %s3360_s30, %s3360_s30 }
  0x14   :  { %p3367_p8 = por %p3366_p7, %p3365_p6 }
  0x16   :  { %p3368_p9 = pnand %p3367_p8, %p3361_p5 }
  0x18   :  { %3371 = shalt.err (!%p3368_p9)
}
  0x19   :  { %s3489_s10 = smov [#allocation12]   ;;  %s3490_s13 = smov [#allocation2]  }
  0x1a   :  { %98 = dma.vmem_to_smem %s96_s23, 16, %s3489_s10, [#allocation13]  }
  0x1b   :  { %s30_s14 = sshll.u32 %s3490_s13, 4  ;;  %s31_s14 = int_to_ptr.vmem [resolvable:$true] %s30_s14 }
  0x1c   :  { %s3380_s15 = scalar_lea.vmem %s31_s14, 512  ;;  %p3385_p11 = scmp.lt.s32.totalorder %s31_s14, %s31_s14 }
  0x1d   :  { %p3381_p10 = scmp.ne.s32.totalorder %s31_s14, %s3380_s15  ;;  %p3386_p12 = scmp.lt.s32.totalorder %s3380_s15, %s3380_s15 }
  0x1f   :  { %p3387_p13 = por %p3386_p12, %p3385_p11 }
  0x21   :  { %p3388_p0 = pnand %p3387_p13, %p3381_p10 }
  0x23   :  { %3391 = shalt.err (!%p3388_p0)
}
  0x24   :  { %s3491_s2 = smov 128   ;;  %s3492_s16 = smov 8  }
  0x25   :  { %36 = dma.hbm_to_vmem [thread:$0]  %s4208_s1, 512, %s31_s14, [#allocation3], %s3491_s2, %s3491_s2, %s3492_s16  }
  0x26   :  { %s3493_s19 = smov [#allocation8]   ;;  %s3494_s21 = smov [#allocation9]  }
  0x27   :  { %s52_s20 = sshll.u32 %s3493_s19, 4  ;;  %s64_s22 = sshll.u32 %s3494_s21, 4  ;;  %s53_s20 = int_to_ptr.vmem [resolvable:$true] %s52_s20  ;;  %s65_s22 = int_to_ptr.vmem [resolvable:$true] %s64_s22 }
  0x28   :  { %s3400_s23 = scalar_lea.vmem %s53_s20, 512  ;;  %p3405_p2 = scmp.lt.s32.totalorder %s53_s20, %s53_s20 }
  0x29   :  { %p3401_p1 = scmp.ne.s32.totalorder %s53_s20, %s3400_s23  ;;  %p3406_p3 = scmp.lt.s32.totalorder %s3400_s23, %s3400_s23 }
  0x2b   :  { %p3407_p4 = por %p3406_p3, %p3405_p2 }
  0x2d   :  { %p3408_p5 = pnand %p3407_p4, %p3401_p1 }
  0x2f   :  { %3411 = shalt.err (!%p3408_p5)
}
  0x30   :  { %58 = dma.hbm_to_vmem [thread:$0]  %s4210_s3, 512, %s53_s20, [#allocation7], %s3491_s2, %s3491_s2, %s3492_s16  }
  0x31   :  { %s85_s27 = sshll.u32 %s4216_s9, 4  ;;  %s3420_s28 = scalar_lea.vmem %s65_s22, 32  ;;  %s86_s27 = int_to_ptr.vmem [resolvable:$true] %s85_s27 }
  0x32   :  { %p3421_p6 = scmp.ne.s32.totalorder %s65_s22, %s3420_s28  ;;  %p3425_p7 = scmp.lt.s32.totalorder %s65_s22, %s65_s22 }
  0x33   :  { %p3426_p8 = scmp.lt.s32.totalorder %s3420_s28, %s3420_s28 }
  0x35   :  { %p3427_p9 = por %p3426_p8, %p3425_p7 }
  0x37   :  { %p3428_p10 = pnand %p3427_p9, %p3421_p6 }
  0x39   :  { %3431 = shalt.err (!%p3428_p10)
}
  0x3a   :  { %s3495_s29 = smov 16   ;;  %s3496_s30 = smov 1  }
  0x3b   :  { %70 = dma.hbm_to_vmem [thread:$0]  %s4211_s4, 32, %s65_s22, [#allocation10], %s3495_s29, %s3495_s29, %s3496_s30  }
  0x3c   :  { %s3432_s3 = scalar_lea.vmem %s86_s27, 16  ;;  %p3437_p12 = scmp.lt.s32.totalorder %s86_s27, %s86_s27 }
  0x3d   :  { %p3433_p11 = scmp.ne.s32.totalorder %s86_s27, %s3432_s3  ;;  %p3438_p13 = scmp.lt.s32.totalorder %s3432_s3, %s3432_s3 }
  0x3f   :  { %p3439_p0 = por %p3438_p13, %p3437_p12 }
  0x41   :  { %p3440_p1 = pnand %p3439_p0, %p3433_p11 }
  0x43   :  { %3443 = shalt.err (!%p3440_p1)
}
  0x44   :  { %s3497_s9 = smov [#allocation11]   ;;  %s105_s17 = sshll.u32 %s4218_s11, 4  ;;  %s106_s17 = int_to_ptr.vmem [resolvable:$true] %s105_s17 }
  0x45   :  { %88 = dma.vmem_to_smem %s86_s27, 16, %s3497_s9, [#allocation5]  }
  0x46   :  { %s3444_s18 = scalar_lea.vmem %s106_s17, 16  ;;  %p3449_p3 = scmp.lt.s32.totalorder %s106_s17, %s106_s17 }
  0x47   :  { %p3445_p2 = scmp.ne.s32.totalorder %s106_s17, %s3444_s18  ;;  %p3450_p4 = scmp.lt.s32.totalorder %s3444_s18, %s3444_s18 }
  0x49   :  { %p3451_p5 = por %p3450_p4, %p3449_p3 }
  0x4b   :  { %p3452_p6 = pnand %p3451_p5, %p3445_p2 }
  0x4d   :  { %3455 = shalt.err (!%p3452_p6)
}
  0x4e   :  { %s3498_s4 = smov [#allocation14]  }
  0x4f   :  { %108 = dma.vmem_to_smem %s106_s17, 16, %s3498_s4, [#allocation13]  }
  0x50   :  { %3476 = dma.done.wait [#allocation3], 512  }
  0x51   :  { %3477 = vsyncadd [#allocation3], 4294966784 }
  0x52   :  { %3478 = dma.done.wait [#allocation7], 528  }
  0x53   :  { %3479 = vsyncadd [#allocation7], 4294966768 }
  0x54   :  { %3480 = dma.done.wait [#allocation10], 32  }
  0x55   :  { %3481 = vsyncadd [#allocation10], 4294967264 }
  0x56   :  { %3482 = dma.done.wait [#allocation5], 16  }
  0x57   :  { %3483 = vsyncadd [#allocation5], 4294967280 }
  0x58   :  { %3484 = dma.done.wait [#allocation13], 32  }
  0x59   :  { %3485 = vsyncadd [#allocation13], 4294967264 }
  0x5a   :  { %130 = sfence }
  0x5b   :  { %v138_v0 = vld [vmem:[#allocation2 + $0x18] sm:$0xff]  ;;  %v137_v1 = vld [vmem:[#allocation2 + $0x10] sm:$0xff]  ;;  %vm146_vm0 = vcmask 261120   ;;  %v248_v2 = vlaneseq  ;;  %v131_v3 = vld [vmem:[%s4207_s0] sm:$0xff]  ;;  %v4220_v12 = vmov 1.0   ;;  %v3500_v18 = vmov 0.0  }
  0x5c   :  { %3065 = vmatprep.subr.mxu0 %v138_v0  ;;  %v136_v4 = vld [vmem:[#allocation2 + $0x8] sm:$0xff]  ;;  %3073 = vmatprep.mubr.msk.f32.mxu0 %vm146_vm0, %v131_v3  ;;  %v2874_v6 = vld [vmem:[%s4214_s7] ss:$0 sm:$0xff]  ;;  %v133_v11 = vld [vmem:[%s4207_s0 + $0x10] sm:$0xff]  ;;  %v3501_v31 = vmov 0   ;;  %vm544_vm9 = vcmask 64512  }
  0x5d   :  { %3066 = vmatpush3.msra.mxu0 %v138_v0  ;;  %v3614_v5 = vshrl.u32 %v248_v2, 7  ;;  %v135_v7 = vld [vmem:[#allocation2] sm:$0xff]  ;;  %v132_v9 = vld [vmem:[%s4207_s0 + $0x8] sm:$0xff]  ;;  %v134_v13 = vld [vmem:[%s4207_s0 + $0x18] sm:$0xff]  ;;  %3274 = vset.pattern.permute.xlu0 %v3501_v31  ;;  %s3503_s22 = smov 64   ;;  %s350_s23 = sld [smem:[#allocation12]] }
  0x5e   :  { %3067 = vmatprep.subr.mxu0 %v137_v1  ;;  %v2875_v14 = vld [vmem:[%s4214_s7 + $0x1] ss:$0 sm:$0xff]  ;;  %v2868_v15 = vld [vmem:[%s4213_s6] ss:$0 sm:$0xff]  ;;  %v2881_v27 = vld [vmem:[%s4215_s8 + $0x4] ss:$0 sm:$0xff]  ;;  %3275 = vset.pattern.permute.xlu1 %v3501_v31 }
  0x5f   :  { %3068 = vmatpush3.msra.mxu0 %v137_v1  ;;  %v3620_v8 = vadd.s32 8, %v3614_v5  ;;  %vm3652_vm2 = vcmp.eq.s32.totalorder %v3614_v5, %v2874_v6  ;;  %vm315_vm4 = vcmp.eq.s32.totalorder %v3614_v5, %v2868_v15  ;;  %v2880_v20 = vld [vmem:[%s4215_s8] ss:$0 sm:$0xff]  ;;  %vm3687_vm6 = vcmp.eq.s32.totalorder %v3614_v5, %v2875_v14  ;;  %v2869_v25 = vld [vmem:[%s4213_s6 + $0x1] ss:$0 sm:$0xff]  ;;  %s3502_s6 = smov 96  }
  0x60   :  { %3069 = vmatprep.subr.mxu0 %v136_v4  ;;  %v3670_v19 = vsel %vm315_vm4, 1.0, %v3500_v18  ;;  %vm317_vm7 = vcmp.eq.s32.totalorder %v3614_v5, %v2869_v25  ;;  %v2859_v32 = vld [vmem:[#allocation6] ss:$0 sm:$0xff]  ;;  %v260_v44 = vld [vmem:[%s4212_s5 + $0x8] sm:$0xff]  ;;  %v262_v45 = vld [vmem:[%s4212_s5 + $0x18] sm:$0xff]  ;;  %s3801_s24 = sld [smem:[#allocation14]] }
  0x61   :  { %3070 = vmatpush3.msra.mxu0 %v136_v4  ;;  %vm3626_vm1 = vcmp.eq.s32.totalorder %v3620_v8, %v2874_v6  ;;  %vm3657_vm3 = vcmp.eq.s32.totalorder %v3620_v8, %v2875_v14  ;;  %vm316_vm5 = vcmp.eq.s32.totalorder %v3620_v8, %v2868_v15  ;;  %v384_v22 = vmul.f32 %v2880_v20, %v3670_v19  ;;  %v259_v43 = vld [vmem:[%s4212_s5] sm:$0xff]  ;;  %v261_v46 = vld [vmem:[%s4212_s5 + $0x10] sm:$0xff]  ;;  %s349_s5 = sld [smem:[#allocation11]]  ;;  %s3504_s26 = smov 88  }
  0x62   :  { %3071 = vmatprep.subr.mxu0 %v135_v7  ;;  %3079 = vmatprep.subr.msk.mxu1 %vm3626_vm1, %v4220_v12  ;;  %v3682_v21 = vsel %vm316_vm5, 1.0, %v3500_v18  ;;  %vm318_vm8 = vcmp.eq.s32.totalorder %v3620_v8, %v2869_v25  ;;  %v3703_v26 = vsel %vm317_vm7, 1.0, %v3500_v18  ;;  %v3790_v60 = vld [vmem:[#allocation8 + $0x8] sm:$0xff]  ;;  %v3792_v62 = vld [vmem:[#allocation8] sm:$0xff]  ;;  %v3795_v0 = vld [vmem:[#allocation8 + $0x18] sm:$0xff]  ;;  %vm736_vm13 = vcmask 130048  }
  0x63   :  { %3072 = vmatpush3.msra.mxu0 %v135_v7  ;;  %3080 = vmatpush3.xpose.msk.msra.mxu1 %vm3626_vm1, %v4220_v12  ;;  %v385_v23 = vmul.f32 %v2880_v20, %v3682_v21  ;;  %v3709_v28 = vsel %vm318_vm8, 1.0, %v3500_v18  ;;  %v386_v29 = vmul.f32 %v2881_v27, %v3703_v26  ;;  %v3798_v3 = vld [vmem:[#allocation8 + $0x10] sm:$0xff]  ;;  %v365_v7 = vstv %s350_s23  ;;  %v2866_v25 = vld [vmem:[#allocation9] ss:$0 sm:$0xff]  ;;  %s3505_s27 = smov 120   ;;  %s3506_s28 = smov 56  }
  0x64   :  { %3074 = vmatmul.mubr.msk.f32.vlgmr.msra.gmra.mxu0 %vm146_vm0, %v132_v9  ;;  %3081 = vmatprep.subr.msk.mxu1 %vm3652_vm2, %v4220_v12  ;;  %v387_v30 = vmul.f32 %v2881_v27, %v3709_v28  ;;  %s2898_s0 = sld [smem:[#allocation11 + $0x1]]  ;;  %s3507_s3 = smov 80   ;;  %v2944_v16 = vld [vmem:[%s4215_s8 + $0x7] ss:$0 sm:$0xff] }
  0x65   :  { %3076 = vmatprep.mubr.msk.f32.mxu0 %vm146_vm0, %v133_v11  ;;  %3086 = vmatprep.subr.msk.mxu0 %vm3657_vm3, %v4220_v12  ;;  %s2899_s7 = sld [smem:[#allocation12 + $0x1]]  ;;  %s3508_s9 = smov 112  }
  0x66   :  { %3087 = vmatpush3.xpose.msk.msra.mxu0 %vm3657_vm3, %v4220_v12  ;;  %3083 = vmatprep.mubr.f32.mxu1 %v384_v22  ;;  %s2900_s13 = sld [smem:[#allocation14 + $0x1]]  ;;  %s3509_s14 = smov 48  }
  0x67   :  { %3082 = vmatpush3.xpose.msk.msra.mxu1 %vm3652_vm2, %v4220_v12  ;;  %3088 = vmatprep.subr.msk.mxu0 %vm3687_vm6, %v4220_v12  ;;  %v356_v61 = vstv %s349_s5  ;;  %s2919_s4 = sld [smem:[#allocation11 + $0x2]]  ;;  %s3510_s20 = smov 72  }
  0x68   :  { %3077 = vmatmul.mubr.msk.f32.gmra.mxu0 %vm146_vm0, %v134_v13  ;;  %v358_v63 = vsub.f32 %v3790_v60, %v356_v61  ;;  %v357_v1 = vsub.f32 %v3792_v62, %v356_v61  ;;  %v360_v6 = vsub.f32 %v3795_v0, %v356_v61  ;;  %v359_v11 = vsub.f32 %v3798_v3, %v356_v61  ;;  %s2920_s11 = sld [smem:[#allocation12 + $0x2]]  ;;  %s3511_s21 = smov 104  }
  0x69   :  { %3090 = vmatprep.mubr.f32.mxu0 %v386_v29  ;;  %v252_v13 = vand.u32 127, %v248_v2  ;;  %s2921_s19 = sld [smem:[#allocation14 + $0x2]] }
  0x6a   :  { %3084 = vmatmul.mubr.f32.vlgmr.msra.gmra.mxu1 %v385_v23  ;;  %3089 = vmatpush3.xpose.msk.msra.mxu0 %vm3687_vm6, %v4220_v12  ;;  %v362_v4 = vmul.f32 %v358_v63, %v358_v63  ;;  %v361_v9 = vmul.f32 %v357_v1, %v357_v1  ;;  %v364_v15 = vmul.f32 %v360_v6, %v360_v6  ;;  %s2941_s1 = sld [smem:[#allocation12 + $0x3]] }
  0x6b   :  { %v363_v23 = vmul.f32 %v359_v11, %v359_v11  ;;  %vm254_vm10 = vcmp.eq.s32.totalorder %v3620_v8, %v252_v13  ;;  %vm253_vm11 = vcmp.eq.s32.totalorder %v3614_v5, %v252_v13 }
  0x6c   :  { %v367_v14 = vmul.f32 %v365_v7, %v362_v4  ;;  %v366_v22 = vmul.f32 %v365_v7, %v361_v9  ;;  %v369_v29 = vmul.f32 %v365_v7, %v364_v15 }
  0x6d   :  { %3091 = vmatmul.mubr.f32.vlgmr.msra.gmra.mxu0 %v387_v30  ;;  %v368_v2 = vmul.f32 %v365_v7, %v363_v23 }
  0x6e   :  { %v371_v27 = vmax.f32 %v367_v14, -13.815511 }
 0x124   :  { %v3075_v33 = vpop.f32.mrf.mxu0 }
 0x125   :  { %v3713_v34 = vadd.f32 %v3075_v33, %v2859_v32  ;;  %v725_v33 = vstv %s3801_s24 }
 0x126   :  { %v225_v35 = vpop.f32.mrf.mxu0 }
 0x127   :  { %v3715_v36 = vadd.f32 %v2859_v32, %v225_v35  ;;  %542 = vrot.lane.b32.xlu0 %v3713_v34, %s3502_s6  ;;  %v3760_v50 = vmul.f32 0.35355338, %v3713_v34  ;;  %v370_v35 = vmax.f32 %v366_v22, -13.815511 }
 0x128   :  { %v3078_v37 = vpop.f32.mrf.mxu0 }
 0x129   :  { %v3718_v38 = vadd.f32 %v3078_v37, %v2859_v32  ;;  %v3721_v39 = vmul.f32 0.35355338, %v3715_v36 }
 0x12a   :  { %v235_v40 = vpop.f32.mrf.mxu0  ;;  %v3085_v20 = vpop.f32.mrf.mxu1 }
 0x12b   :  { %v3723_v41 = vadd.f32 %v2859_v32, %v235_v40  ;;  %634 = vrot.lane.b32.xlu1 %v3718_v38, %s3502_s6  ;;  %540 = vrot.lane.b32.xlu0 %v3715_v36, %s3502_s6  ;;  %v3767_v52 = vmul.f32 0.35355338, %v3718_v38  ;;  %v3808_v32 = vsel %vm254_vm10, 1.0, %v3500_v18 }
 0x12c   :  { %3097 = vmatprep.mubr.msk.f32.mxu1 %vm544_vm9, %v3721_v39  ;;  %v454_v30 = vpop.f32.mrf.mxu1 }
 0x12d   :  { %v3730_v42 = vmul.f32 0.35355338, %v3723_v41  ;;  %v3092_v31 = vpop.f32.mrf.mxu0 }
 0x12f   :  { %632 = vrot.lane.b32.xlu1 %v3723_v41, %s3502_s6  ;;  %3104 = vmatprep.mubr.msk.f32.mxu0 %vm544_vm9, %v3730_v42  ;;  %v529_v5 = vpop.f32.mrf.mxu0 }
 0x130   :  { %267 = vperm.xlu0 %3274, %v259_v43   ;;  %v3814_v43 = vsel %vm253_vm11, 1.0, %v3500_v18 }
 0x133   :  { %272 = vperm.xlu1 %3275, %v260_v44   ;;  %v373_v44 = vmax.f32 %v369_v29, -13.815511  ;;  %v2901_v29 = vld [vmem:[%s4215_s8 + $0x1] ss:$0 sm:$0xff] }
 0x134   :  { %282 = vperm.xlu0 %3274, %v262_v45   ;;  %v727_v45 = vmul.f32 %v3808_v32, %v725_v33 }
 0x137   :  { %277 = vperm.xlu1 %3275, %v261_v46  }
 0x138   :  { %775 = vrot.lane.b32.xlu0 %v3713_v34, %s3503_s22 }
 0x13b   :  { %773 = vrot.lane.b32.xlu1 %v3715_v36, %s3503_s22 }
 0x13f   :  { %862 = vrot.lane.b32.xlu1 %v3718_v38, %s3503_s22 }
 0x199   :  { %v543_v47 = vpop.permute.xlu0 %542 }
 0x19a   :  { %3093 = vmatprep.subr.msk.mxu1 %vm544_vm9, %v543_v47 }
 0x19b   :  { %3094 = vmatpush3.xpose.msk.msra.mxu1 %vm544_vm9, %v543_v47 }
 0x19d   :  { %v635_v48 = vpop.permute.xlu1 %634  ;;  %v541_v49 = vpop.permute.xlu0 %540 }
 0x19e   :  { %3095 = vmatprep.subr.msk.mxu1 %vm544_vm9, %v541_v49  ;;  %3100 = vmatprep.subr.msk.mxu0 %vm544_vm9, %v635_v48 }
 0x19f   :  { %3096 = vmatpush3.xpose.msk.msra.mxu1 %vm544_vm9, %v541_v49  ;;  %3101 = vmatpush3.xpose.msk.msra.mxu0 %vm544_vm9, %v635_v48  ;;  %v2867_v48 = vld [vmem:[#allocation9 + $0x1] ss:$0 sm:$0xff] }
 0x1a1   :  { %v633_v51 = vpop.permute.xlu1 %632 }
 0x1a2   :  { %3098 = vmatmul.mubr.msk.f32.vlgmr.msra.gmra.mxu1 %vm544_vm9, %v3760_v50  ;;  %3102 = vmatprep.subr.msk.mxu0 %vm544_vm9, %v633_v51 }
 0x1a3   :  { %3103 = vmatpush3.xpose.msk.msra.mxu0 %vm544_vm9, %v633_v51 }
 0x1a4   :  { %3121 = vmatprep.subr.msk.mxu0 %vm3626_vm1, %v4220_v12 }
 0x1a6   :  { %3105 = vmatmul.mubr.msk.f32.vlgmr.msra.gmra.mxu0 %vm544_vm9, %v3767_v52 }
 0x1a7   :  { %3122 = vmatpush3.xpose.msk.msra.mxu0 %vm3626_vm1, %v4220_v12 }
 0x1a8   :  { %3123 = vmatprep.subr.msk.mxu0 %vm3652_vm2, %v4220_v12 }
 0x1ab   :  { %v268_v53 = vpop.permute.xlu0 %267  ;;  %3124 = vmatpush3.xpose.msk.msra.mxu0 %vm3652_vm2, %v4220_v12 }
 0x1ac   :  { %v3817_v46 = vmul.f32 %v2866_v25, %v268_v53 }
 0x1ae   :  { %v273_v54 = vpop.permute.xlu1 %272  ;;  %vm301_vm14 = vcmp.gt.f32.partialorder %v3817_v46, 0.5 }
 0x1af   :  { %v3783_v55 = vpop.permute.xlu0 %282  ;;  %v3811_v37 = vmul.f32 %v2866_v25, %v273_v54 }
 0x1b0   :  { %v3823_v53 = vmul.f32 %v2867_v48, %v3783_v55 }
 0x1b1   :  { %vm302_vm12 = vcmp.gt.f32.partialorder %v3811_v37, 0.5 }
 0x1b2   :  { %v3785_v56 = vpop.permute.xlu1 %277  ;;  %vm304_vm15 = vcmp.gt.f32.partialorder %v3823_v53, 0.5 }
 0x1b3   :  { %v776_v57 = vpop.permute.xlu0 %775  ;;  %v3828_v11 = vmul.f32 %v2867_v48, %v3785_v56 }
 0x1b4   :  { %3107 = vmatprep.subr.mxu1 %v776_v57 }
 0x1b5   :  { %3108 = vmatpush3.msra.mxu1 %v776_v57  ;;  %v372_v57 = vmax.f32 %v368_v2, -13.815511  ;;  %vm303_vm0 = vcmp.gt.f32.partialorder %v3828_v11, 0.5 }
 0x1b6   :  { %v774_v58 = vpop.permute.xlu1 %773 }
 0x1b7   :  { %3109 = vmatprep.subr.mxu1 %v774_v58 }
 0x1b8   :  { %3110 = vmatpush3.msra.mxu1 %v774_v58  ;;  %v726_v58 = vmul.f32 %v3814_v43, %v725_v33 }
 0x1ba   :  { %v3787_v59 = vpop.permute.xlu1 %862 }
 0x1bb   :  { %3114 = vmatprep.subr.mxu1 %v3787_v59 }
 0x262   :  { %v3099_v40 = vpop.f32.mrf.mxu1 }
 0x263   :  { %v627_v8 = vadd.f32 %v3099_v40, %v371_v27 }
 0x264   :  { %v621_v47 = vpop.f32.mrf.mxu1 }
 0x265   :  { %v722_v49 = vadd.f32 %v3085_v20, %v627_v8  ;;  %v622_v51 = vadd.f32 %v621_v47, %v370_v35 }
 0x266   :  { %v3106_v54 = vpop.f32.mrf.mxu0 }
 0x267   :  { %v721_v61 = vadd.f32 %v622_v51, %v454_v30  ;;  %v718_v18 = vadd.f32 %v3106_v54, %v373_v44  ;;  %v729_v63 = vadd.f32 %v727_v45, %v722_v49  ;;  %v994_v30 = vmul.f32 %v2901_v29, %v3670_v19 }
 0x268   :  { %v712_v1 = vpop.f32.mrf.mxu0 }
 0x269   :  { %v724_v4 = vadd.f32 %v3092_v31, %v718_v18  ;;  %v713_v6 = vadd.f32 %v712_v1, %v372_v57  ;;  %v733_v7 = vsel %vm302_vm12, %v729_v63, -1000000.0  ;;  %v728_v9 = vadd.f32 %v726_v58, %v721_v61  ;;  %3125 = vmatprep.mubr.f32.mxu0 %v994_v30 }
 0x26a   :  { %v740_v13 = vsel %vm736_vm13, %v733_v7, -inf  ;;  %v995_v31 = vmul.f32 %v2901_v29, %v3682_v21  ;;  %v975_v30 = vstv %s2899_s7 }
 0x26b   :  { %v723_v14 = vadd.f32 %v713_v6, %v529_v5  ;;  %741 = vmax.xlane.f32.xlu0 %v740_v13  ;;  %v732_v15 = vsel %vm301_vm14, %v728_v9, -1000000.0  ;;  %v731_v20 = vadd.f32 %v727_v45, %v724_v4  ;;  %v2902_v4 = vld [vmem:[%s4215_s8 + $0x5] ss:$0 sm:$0xff] }
 0x26c   :  { %v737_v55 = vsel %vm736_vm13, %v732_v15, -inf  ;;  %3126 = vmatmul.mubr.f32.vlgmr.msra.gmra.mxu0 %v995_v31  ;;  %v996_v13 = vmul.f32 %v2902_v4, %v3703_v26 }
 0x26d   :  { %738 = vmax.xlane.f32.xlu1 %v737_v55  ;;  %v730_v22 = vadd.f32 %v726_v58, %v723_v14  ;;  %v735_v23 = vsel %vm304_vm15, %v731_v20, -1000000.0 }
 0x26e   :  { %v746_v27 = vsel %vm736_vm13, %v735_v23, -inf }
 0x26f   :  { %v734_v56 = vsel %vm303_vm0, %v730_v22, -1000000.0  ;;  %v997_v22 = vmul.f32 %v2902_v4, %v3709_v28 }
 0x270   :  { %v743_v25 = vsel %vm736_vm13, %v734_v56, -inf }
 0x271   :  { %744 = vmax.xlane.f32.xlu0 %v743_v25  ;;  %747 = vmax.xlane.f32.xlu1 %v746_v27 }
 0x282   :  { %1154 = vrot.lane.b32.xlu1 %v3713_v34, %s3504_s26 }
 0x286   :  { %1152 = vrot.lane.b32.xlu1 %v3715_v36, %s3504_s26 }
 0x287   :  { %860 = vrot.lane.b32.xlu0 %v3723_v41, %s3503_s22  ;;  %s3512_s22 = smov 40  }
 0x28a   :  { %1148 = vrot.lane.b32.xlu1 %v3721_v39, %s3505_s27 }
 0x28b   :  { %1245 = vrot.lane.b32.xlu0 %v3718_v38, %s3504_s26 }
 0x28e   :  { %1150 = vrot.lane.b32.xlu1 %v3760_v50, %s3505_s27 }
 0x28f   :  { %1243 = vrot.lane.b32.xlu0 %v3723_v41, %s3504_s26  ;;  %s2942_s26 = sld [smem:[#allocation14 + $0x3]] }
 0x292   :  { %1470 = vrot.lane.b32.xlu1 %v3718_v38, %s3506_s28 }
 0x293   :  { %1239 = vrot.lane.b32.xlu0 %v3730_v42, %s3505_s27 }
 0x296   :  { %1381 = vrot.lane.b32.xlu1 %v3715_v36, %s3506_s28 }
 0x297   :  { %1241 = vrot.lane.b32.xlu0 %v3767_v52, %s3505_s27  ;;  %s3514_s27 = smov [#allocation15]  }
 0x29b   :  { %1383 = vrot.lane.b32.xlu0 %v3713_v34, %s3506_s28 }
 0x2f4   :  { %v742_v33 = vpop.xlane.xlu0 %741 }
 0x2f5   :  { %v750_v35 = vsub.f32 %v733_v7, %v742_v33 }
 0x2f6   :  { %v739_v2 = vpop.xlane.xlu1 %738 }
 0x2f7   :  { %v749_v40 = vsub.f32 %v732_v15, %v739_v2  ;;  %v755_v8 = vmul.f32 1.442695, %v750_v35 }
 0x2f9   :  { %v753_v44 = vmul.f32 1.442695, %v749_v40 }
 0x2fa   :  { %v745_v45 = vpop.xlane.xlu0 %744  ;;  %v748_v5 = vpop.xlane.xlu1 %747 }
 0x2fb   :  { %3276 = vpow2.f32 %v753_v44  ;;  %v751_v47 = vsub.f32 %v734_v56, %v745_v45  ;;  %v752_v48 = vsub.f32 %v735_v23, %v748_v5  ;;  %v966_v56 = vstv %s2898_s0 }
 0x2fc   :  { %3278 = vpow2.f32 %v755_v8  ;;  %v968_v25 = vsub.f32 %v3790_v60, %v966_v56  ;;  %v967_v27 = vsub.f32 %v3792_v62, %v966_v56  ;;  %v1334_v44 = vstv %s2900_s13 }
 0x2fd   :  { %v757_v49 = vmul.f32 1.442695, %v751_v47  ;;  %v759_v51 = vmul.f32 1.442695, %v752_v48 }
 0x2fe   :  { %v861_v57 = vpop.permute.xlu0 %860  ;;  %v1155_v58 = vpop.permute.xlu1 %1154  ;;  %v972_v29 = vmul.f32 %v968_v25, %v968_v25  ;;  %v971_v31 = vmul.f32 %v967_v27, %v967_v27 }
 0x2ff   :  { %3280 = vpow2.f32 %v757_v49  ;;  %3135 = vmatprep.subr.msk.mxu0 %vm544_vm9, %v1155_v58  ;;  %v1336_v49 = vmul.f32 %v3808_v32, %v1334_v44 }
 0x300   :  { %3282 = vpow2.f32 %v759_v51  ;;  %3136 = vmatpush3.xpose.msk.msra.mxu0 %vm544_vm9, %v1155_v58  ;;  %v977_v35 = vmul.f32 %v975_v30, %v972_v29  ;;  %v976_v2 = vmul.f32 %v975_v30, %v971_v31 }
 0x302   :  { %v1246_v54 = vpop.permute.xlu0 %1245  ;;  %v1153_v61 = vpop.permute.xlu1 %1152  ;;  %v981_v8 = vmax.f32 %v977_v35, -13.815511  ;;  %v980_v5 = vmax.f32 %v976_v2, -13.815511 }
 0x303   :  { %3137 = vmatprep.subr.msk.mxu0 %vm544_vm9, %v1153_v61 }
 0x304   :  { %3138 = vmatpush3.xpose.msk.msra.mxu0 %vm544_vm9, %v1153_v61  ;;  %v1335_v61 = vmul.f32 %v3814_v43, %v1334_v44 }
 0x306   :  { %v1244_v18 = vpop.permute.xlu0 %1243  ;;  %v1149_v63 = vpop.permute.xlu1 %1148 }
 0x307   :  { %3139 = vmatprep.mubr.msk.f32.mxu0 %vm544_vm9, %v1149_v63 }
 0x308   :  { %v3868_v1 = vpop.eup %3276 }
 0x309   :  { %v3873_v6 = vpop.eup %3278  ;;  %3111 = vmatprep.mubr.msk.f32.mxu1 %vm736_vm13, %v3868_v1 }
 0x30a   :  { %v1240_v7 = vpop.permute.xlu0 %1239  ;;  %3112 = vmatmul.mubr.msk.f32.vlgmr.msra.gmra.mxu1 %vm736_vm13, %v3873_v6  ;;  %v1151_v9 = vpop.permute.xlu1 %1150 }
 0x30b   :  { %3115 = vmatpush3.msra.mxu1 %v3787_v59  ;;  %3140 = vmatmul.mubr.msk.f32.vlgmr.msra.gmra.mxu0 %vm544_vm9, %v1151_v9 }
 0x30c   :  { %v3882_v14 = vpop.eup %3280  ;;  %3116 = vmatprep.subr.mxu1 %v861_v57 }
 0x30d   :  { %v3884_v15 = vpop.eup %3282  ;;  %3117 = vmatpush3.msra.mxu1 %v861_v57  ;;  %3118 = vmatprep.mubr.msk.f32.mxu1 %vm736_vm13, %v3882_v14 }
 0x30e   :  { %3128 = vmatprep.subr.msk.mxu1 %vm3657_vm3, %v4220_v12  ;;  %v1242_v20 = vpop.permute.xlu0 %1241  ;;  %3119 = vmatmul.mubr.msk.f32.vlgmr.msra.gmra.mxu1 %vm736_vm13, %v3884_v15  ;;  %v1471_v59 = vpop.permute.xlu1 %1470 }
 0x30f   :  { %3129 = vmatpush3.xpose.msk.msra.mxu1 %vm3657_vm3, %v4220_v12  ;;  %3132 = vmatprep.mubr.f32.mxu1 %v996_v13 }
 0x310   :  { %3130 = vmatprep.subr.msk.mxu1 %vm3687_vm6, %v4220_v12 }
 0x312   :  { %v1384_v55 = vpop.permute.xlu0 %1383  ;;  %v1382_v23 = vpop.permute.xlu1 %1381 }
 0x313   :  { %3131 = vmatpush3.xpose.msk.msra.mxu1 %vm3687_vm6, %v4220_v12  ;;  %3149 = vmatprep.subr.mxu0 %v1384_v55 }
 0x314   :  { %3142 = vmatprep.subr.msk.mxu1 %vm544_vm9, %v1246_v54  ;;  %3150 = vmatpush3.msra.mxu0 %v1384_v55 }
 0x315   :  { %3151 = vmatprep.subr.mxu0 %v1382_v23 }
 0x316   :  { %3133 = vmatmul.mubr.f32.vlgmr.msra.gmra.mxu1 %v997_v22  ;;  %3152 = vmatpush3.msra.mxu0 %v1382_v23 }
 0x317   :  { %3143 = vmatpush3.xpose.msk.msra.mxu1 %vm544_vm9, %v1246_v54  ;;  %3146 = vmatprep.mubr.msk.f32.mxu1 %vm544_vm9, %v1240_v7  ;;  %v969_v7 = vsub.f32 %v3798_v3, %v966_v56 }
 0x318   :  { %3144 = vmatprep.subr.msk.mxu1 %vm544_vm9, %v1244_v18  ;;  %3163 = vmatprep.subr.msk.mxu0 %vm3626_vm1, %v4220_v12 }
 0x319   :  { %v973_v25 = vmul.f32 %v969_v7, %v969_v7 }
 0x31b   :  { %3145 = vmatpush3.xpose.msk.msra.mxu1 %vm544_vm9, %v1244_v18  ;;  %v970_v18 = vsub.f32 %v3795_v0, %v966_v56  ;;  %v978_v31 = vmul.f32 %v975_v30, %v973_v25 }
 0x31c   :  { %3156 = vmatprep.subr.mxu1 %v1471_v59 }
 0x31d   :  { %v974_v55 = vmul.f32 %v970_v18, %v970_v18  ;;  %v982_v2 = vmax.f32 %v978_v31, -13.815511 }
 0x31e   :  { %3147 = vmatmul.mubr.msk.f32.vlgmr.msra.gmra.mxu1 %vm544_vm9, %v1242_v20 }
 0x31f   :  { %3157 = vmatpush3.msra.mxu1 %v1471_v59  ;;  %v979_v56 = vmul.f32 %v975_v30, %v974_v55  ;;  %v2922_v55 = vld [vmem:[%s4215_s8 + $0x2] ss:$0 sm:$0xff] }
 0x320   :  { %v1619_v25 = vmul.f32 %v2922_v55, %v3670_v19 }
 0x32c   :  { %v3127_v33 = vpop.f32.mrf.mxu0 }
 0x32e   :  { %v1064_v40 = vpop.f32.mrf.mxu0 }
 0x3ca   :  { %v3914_v45 = vpop.f32.mrf.mxu1 }
 0x3cb   :  { %v3141_v47 = vpop.f32.mrf.mxu0 }
 0x3cc   :  { %v1236_v48 = vadd.f32 %v3141_v47, %v981_v8  ;;  %v3917_v58 = vpop.f32.mrf.mxu1 }
 0x3cd   :  { %v1230_v51 = vpop.f32.mrf.mxu0 }
 0x3ce   :  { %v1331_v57 = vadd.f32 %v3127_v33, %v1236_v48  ;;  %v1231_v54 = vadd.f32 %v1230_v51, %v980_v5  ;;  %v3922_v9 = vpop.f32.mrf.mxu1  ;;  %v983_v33 = vmax.f32 %v979_v56, -13.815511 }
 0x3cf   :  { %4230 = vst [vmem:[#allocation22_spill] sm:$0xff] %v3922_v9 }
 0x3d0   :  { %v1330_v63 = vadd.f32 %v1231_v54, %v1064_v40  ;;  %v1338_v4 = vadd.f32 %v1336_v49, %v1331_v57  ;;  %v3930_v27 = vpop.f32.mrf.mxu1 }
 0x3d1   :  { %4231 = vst [vmem:[#allocation23_spill] sm:$0xff] %v3930_v27 }
 0x3d2   :  { %v1342_v13 = vsel %vm302_vm12, %v1338_v4, -1000000.0  ;;  %v1337_v20 = vadd.f32 %v1335_v61, %v1330_v63 }
 0x3d3   :  { %v1348_v59 = vsel %vm736_vm13, %v1342_v13, -inf }
 0x3d4   :  { %1349 = vmax.xlane.f32.xlu0 %v1348_v59  ;;  %v1341_v22 = vsel %vm301_vm14, %v1337_v20, -1000000.0 }
 0x3d5   :  { %v1345_v23 = vsel %vm736_vm13, %v1341_v22, -inf }
 0x3d6   :  { %1346 = vmax.xlane.f32.xlu1 %v1345_v23  ;;  %v3134_v29 = vpop.f32.mrf.mxu1 }
 0x3d8   :  { %v1139_v35 = vpop.f32.mrf.mxu1 }
 0x3de   :  { %v3148_v40 = vpop.f32.mrf.mxu1 }
 0x3df   :  { %v1327_v8 = vadd.f32 %v3148_v40, %v983_v33 }
 0x3e0   :  { %v1321_v44 = vpop.f32.mrf.mxu1 }
 0x3e1   :  { %v1333_v5 = vadd.f32 %v3134_v29, %v1327_v8  ;;  %v1322_v47 = vadd.f32 %v1321_v44, %v982_v2  ;;  %v1620_v8 = vmul.f32 %v2922_v55, %v3682_v21 }
 0x3e3   :  { %v1332_v48 = vadd.f32 %v1322_v47, %v1139_v35  ;;  %v1340_v51 = vadd.f32 %v1336_v49, %v1333_v5 }
 0x3e5   :  { %v1344_v57 = vsel %vm304_vm15, %v1340_v51, -1000000.0  ;;  %v1339_v54 = vadd.f32 %v1335_v61, %v1332_v48 }
 0x3e6   :  { %v1354_v18 = vsel %vm736_vm13, %v1344_v57, -inf }
 0x3e7   :  { %1355 = vmax.xlane.f32.xlu1 %v1354_v18  ;;  %v1343_v30 = vsel %vm303_vm0, %v1339_v54, -1000000.0 }
 0x3e8   :  { %v1351_v63 = vsel %vm736_vm13, %v1343_v30, -inf }
 0x3e9   :  { %1352 = vmax.xlane.f32.xlu0 %v1351_v63 }
 0x3f8   :  { %1779 = vrot.lane.b32.xlu1 %v3713_v34, %s3507_s3 }
 0x3fc   :  { %1777 = vrot.lane.b32.xlu1 %v3715_v36, %s3507_s3 }
 0x3ff   :  { %1468 = vrot.lane.b32.xlu0 %v3723_v41, %s3506_s28  ;;  %s2843_s28 = sshll.u32 %s3514_s27, 4  ;;  %s2844_s28 = int_to_ptr.vmem [resolvable:$true] %s2843_s28 }
 0x400   :  { %1773 = vrot.lane.b32.xlu1 %v3721_v39, %s3508_s9  ;;  %s3456_s30 = scalar_lea.vmem %s2844_s28, 512  ;;  %p3461_p8 = scmp.lt.s32.totalorder %s2844_s28, %s2844_s28 }
 0x401   :  { %p3457_p7 = scmp.ne.s32.totalorder %s2844_s28, %s3456_s30  ;;  %p3462_p9 = scmp.lt.s32.totalorder %s3456_s30, %s3456_s30 }
 0x403   :  { %1870 = vrot.lane.b32.xlu0 %v3718_v38, %s3507_s3  ;;  %p3463_p10 = por %p3462_p9, %p3461_p8 }
 0x404   :  { %1775 = vrot.lane.b32.xlu1 %v3760_v50, %s3508_s9 }
 0x405   :  { %p3464_p11 = pnand %p3463_p10, %p3457_p7 }
 0x407   :  { %1868 = vrot.lane.b32.xlu0 %v3723_v41, %s3507_s3 }
 0x408   :  { %2095 = vrot.lane.b32.xlu1 %v3718_v38, %s3509_s14 }
 0x40b   :  { %1864 = vrot.lane.b32.xlu0 %v3730_v42, %s3508_s9 }
 0x40c   :  { %2006 = vrot.lane.b32.xlu1 %v3715_v36, %s3509_s14 }
 0x40f   :  { %1866 = vrot.lane.b32.xlu0 %v3767_v52, %s3508_s9 }
 0x413   :  { %2008 = vrot.lane.b32.xlu0 %v3713_v34, %s3509_s14 }
 0x45d   :  { %v1350_v49 = vpop.xlane.xlu0 %1349 }
 0x45e   :  { %v1358_v61 = vsub.f32 %v1342_v13, %v1350_v49 }
 0x45f   :  { %v1347_v4 = vpop.xlane.xlu1 %1346 }
 0x460   :  { %v1357_v7 = vsub.f32 %v1341_v22, %v1347_v4  ;;  %v1363_v20 = vmul.f32 1.442695, %v1358_v61 }
 0x462   :  { %v1361_v59 = vmul.f32 1.442695, %v1357_v7 }
 0x464   :  { %3284 = vpow2.f32 %v1361_v59  ;;  %v1591_v59 = vstv %s2919_s4 }
 0x465   :  { %3286 = vpow2.f32 %v1363_v20  ;;  %v1593_v55 = vsub.f32 %v3790_v60, %v1591_v59 }
 0x470   :  { %v1356_v23 = vpop.xlane.xlu1 %1355 }
 0x471   :  { %v3958_v56 = vpop.eup %3284  ;;  %v1360_v29 = vsub.f32 %v1344_v57, %v1356_v23  ;;  %v2923_v57 = vld [vmem:[%s4215_s8 + $0x6] ss:$0 sm:$0xff] }
 0x472   :  { %v3960_v31 = vpop.eup %3286  ;;  %v1353_v33 = vpop.xlane.xlu0 %1352  ;;  %3153 = vmatprep.mubr.msk.f32.mxu0 %vm736_vm13, %v3958_v56  ;;  %v1621_v18 = vmul.f32 %v2923_v57, %v3703_v26  ;;  %v1622_v7 = vmul.f32 %v2923_v57, %v3709_v28  ;;  %v1369_v53 = vsel %vm736_vm13, %v3958_v56, 0.0 }
 0x473   :  { %v1359_v13 = vsub.f32 %v1343_v30, %v1353_v33  ;;  %3154 = vmatmul.mubr.msk.f32.vlgmr.msra.gmra.mxu0 %vm736_vm13, %v3960_v31  ;;  %v1367_v22 = vmul.f32 1.442695, %v1360_v29  ;;  %v1597_v29 = vmul.f32 %v1593_v55, %v1593_v55  ;;  %v1594_v55 = vsub.f32 %v3798_v3, %v1591_v59 }
 0x474   :  { %3164 = vmatpush3.xpose.msk.msra.mxu0 %vm3626_vm1, %v4220_v12  ;;  %v1780_v35 = vpop.permute.xlu1 %1779  ;;  %3167 = vmatprep.mubr.f32.mxu0 %v1619_v25  ;;  %v1592_v25 = vsub.f32 %v3792_v62, %v1591_v59 }
 0x475   :  { %v1365_v2 = vmul.f32 1.442695, %v1359_v13  ;;  %3165 = vmatprep.subr.msk.mxu0 %vm3652_vm2, %v4220_v12  ;;  %v1600_v13 = vstv %s2920_s11 }
 0x476   :  { %v1469_v40 = vpop.permute.xlu0 %1468 }
 0x477   :  { %3288 = vpow2.f32 %v1365_v2  ;;  %3158 = vmatprep.subr.mxu1 %v1469_v40  ;;  %v1602_v2 = vmul.f32 %v1600_v13, %v1597_v29 }
 0x478   :  { %3290 = vpow2.f32 %v1367_v22  ;;  %3159 = vmatpush3.msra.mxu1 %v1469_v40  ;;  %3166 = vmatpush3.xpose.msk.msra.mxu0 %vm3652_vm2, %v4220_v12  ;;  %v1778_v44 = vpop.permute.xlu1 %1777  ;;  %v1596_v22 = vmul.f32 %v1592_v25, %v1592_v25 }
 0x479   :  { %3177 = vmatprep.subr.msk.mxu0 %vm544_vm9, %v1780_v35  ;;  %3170 = vmatprep.subr.msk.mxu1 %vm3657_vm3, %v4220_v12 }
 0x47a   :  { %v1871_v5 = vpop.permute.xlu0 %1870  ;;  %v1601_v40 = vmul.f32 %v1600_v13, %v1596_v22 }
 0x47b   :  { %3168 = vmatmul.mubr.f32.vlgmr.msra.gmra.mxu0 %v1620_v8 }
 0x47c   :  { %3178 = vmatpush3.xpose.msk.msra.mxu0 %vm544_vm9, %v1780_v35  ;;  %v1774_v47 = vpop.permute.xlu1 %1773 }
 0x47d   :  { %3179 = vmatprep.subr.msk.mxu0 %vm544_vm9, %v1778_v44  ;;  %3181 = vmatprep.mubr.msk.f32.mxu0 %vm544_vm9, %v1774_v47  ;;  %v1605_v47 = vmax.f32 %v1601_v40, -13.815511 }
 0x47e   :  { %v1869_v48 = vpop.permute.xlu0 %1868 }
 0x480   :  { %3180 = vmatpush3.xpose.msk.msra.mxu0 %vm544_vm9, %v1778_v44  ;;  %v1776_v51 = vpop.permute.xlu1 %1775  ;;  %v1606_v44 = vmax.f32 %v1602_v2, -13.815511 }
 0x482   :  { %v1865_v54 = vpop.permute.xlu0 %1864 }
 0x483   :  { %3182 = vmatmul.mubr.msk.f32.vlgmr.msra.gmra.mxu0 %vm544_vm9, %v1776_v51 }
 0x484   :  { %v3989_v30 = vpop.eup %3288  ;;  %v2096_v49 = vpop.permute.xlu1 %2095 }
 0x485   :  { %v3991_v63 = vpop.eup %3290  ;;  %3160 = vmatprep.mubr.msk.f32.mxu1 %vm736_vm13, %v3989_v30 }
 0x486   :  { %v1867_v61 = vpop.permute.xlu0 %1866  ;;  %3161 = vmatmul.mubr.msk.f32.vlgmr.msra.gmra.mxu1 %vm736_vm13, %v3991_v63  ;;  %v1378_v11 = vsel %vm736_vm13, %v3991_v63, 0.0 }
 0x487   :  { %3171 = vmatpush3.xpose.msk.msra.mxu1 %vm3657_vm3, %v4220_v12  ;;  %3174 = vmatprep.mubr.f32.mxu1 %v1621_v18 }
 0x488   :  { %3172 = vmatprep.subr.msk.mxu1 %vm3687_vm6, %v4220_v12  ;;  %v2007_v20 = vpop.permute.xlu1 %2006 }
 0x48a   :  { %v2009_v4 = vpop.permute.xlu0 %2008 }
 0x48b   :  { %3173 = vmatpush3.xpose.msk.msra.mxu1 %vm3687_vm6, %v4220_v12  ;;  %3191 = vmatprep.subr.mxu0 %v2009_v4 }
 0x48c   :  { %3184 = vmatprep.subr.msk.mxu1 %vm544_vm9, %v1871_v5  ;;  %3192 = vmatpush3.msra.mxu0 %v2009_v4  ;;  %v1595_v4 = vsub.f32 %v3795_v0, %v1591_v59 }
 0x48d   :  { %3193 = vmatprep.subr.mxu0 %v2007_v20 }
 0x48e   :  { %3175 = vmatmul.mubr.f32.vlgmr.msra.gmra.mxu1 %v1622_v7  ;;  %3194 = vmatpush3.msra.mxu0 %v2007_v20  ;;  %v1599_v40 = vmul.f32 %v1595_v4, %v1595_v4 }
 0x48f   :  { %3185 = vmatpush3.xpose.msk.msra.mxu1 %vm544_vm9, %v1871_v5  ;;  %3188 = vmatprep.mubr.msk.f32.mxu1 %vm544_vm9, %v1865_v54  ;;  %v1959_v5 = vstv %s2921_s19 }
 0x490   :  { %3186 = vmatprep.subr.msk.mxu1 %vm544_vm9, %v1869_v48  ;;  %3205 = vmatprep.subr.msk.mxu0 %vm3626_vm1, %v4220_v12  ;;  %v1961_v57 = vmul.f32 %v3808_v32, %v1959_v5  ;;  %v1604_v59 = vmul.f32 %v1600_v13, %v1599_v40 }
 0x493   :  { %3187 = vmatpush3.xpose.msk.msra.mxu1 %vm544_vm9, %v1869_v48 }
 0x494   :  { %3198 = vmatprep.subr.mxu1 %v2096_v49 }
 0x496   :  { %3189 = vmatmul.mubr.msk.f32.vlgmr.msra.gmra.mxu1 %vm544_vm9, %v1867_v61  ;;  %v1960_v61 = vmul.f32 %v3814_v43, %v1959_v5  ;;  %v1598_v5 = vmul.f32 %v1594_v55, %v1594_v55 }
 0x497   :  { %3199 = vmatpush3.msra.mxu1 %v2096_v49 }
 0x533   :  { %v4017_v23 = vpop.f32.mrf.mxu0 }
 0x535   :  { %v4020_v33 = vpop.f32.mrf.mxu0 }
 0x53b   :  { %v3169_v35 = vpop.f32.mrf.mxu0 }
 0x53d   :  { %v1689_v8 = vpop.f32.mrf.mxu0 }
 0x543   :  { %v3183_v48 = vpop.f32.mrf.mxu0 }
 0x544   :  { %v1861_v51 = vadd.f32 %v3183_v48, %v1606_v44  ;;  %v1603_v48 = vmul.f32 %v1600_v13, %v1598_v5 }
 0x545   :  { %v1855_v54 = vpop.f32.mrf.mxu0 }
 0x546   :  { %v1956_v18 = vadd.f32 %v3169_v35, %v1861_v51  ;;  %v1856_v49 = vadd.f32 %v1855_v54, %v1605_v47  ;;  %v4026_v25 = vpop.f32.mrf.mxu1  ;;  %v1608_v51 = vmax.f32 %v1604_v59, -13.815511  ;;  %v4232_v59 = vmov 1.0  }
 0x548   :  { %v1955_v7 = vadd.f32 %v1856_v49, %v1689_v8  ;;  %v1963_v20 = vadd.f32 %v1961_v57, %v1956_v18  ;;  %v4034_v8 = vpop.f32.mrf.mxu1  ;;  %v1607_v18 = vmax.f32 %v1603_v48, -13.815511 }
 0x54a   :  { %v1967_v29 = vsel %vm302_vm12, %v1963_v20, -1000000.0  ;;  %v1962_v22 = vadd.f32 %v1960_v61, %v1955_v7 }
 0x54b   :  { %v1973_v2 = vsel %vm736_vm13, %v1967_v29, -inf }
 0x54c   :  { %1974 = vmax.xlane.f32.xlu0 %v1973_v2  ;;  %v1966_v35 = vsel %vm301_vm14, %v1962_v22, -1000000.0 }
 0x54d   :  { %v1970_v44 = vsel %vm736_vm13, %v1966_v35, -inf }
 0x54e   :  { %1971 = vmax.xlane.f32.xlu1 %v1970_v44  ;;  %v3176_v47 = vpop.f32.mrf.mxu1 }
 0x550   :  { %v1764_v54 = vpop.f32.mrf.mxu1 }
 0x556   :  { %v3190_v49 = vpop.f32.mrf.mxu1 }
 0x557   :  { %v1952_v7 = vadd.f32 %v3190_v49, %v1608_v51 }
 0x558   :  { %v1946_v20 = vpop.f32.mrf.mxu1 }
 0x559   :  { %v1958_v4 = vadd.f32 %v3176_v47, %v1952_v7  ;;  %v1947_v2 = vadd.f32 %v1946_v20, %v1607_v18  ;;  %v2246_v20 = vmul.f32 %v2944_v16, %v3703_v26 }
 0x55b   :  { %v1957_v12 = vadd.f32 %v1947_v2, %v1764_v54  ;;  %v1965_v27 = vadd.f32 %v1961_v57, %v1958_v4 }
 0x55d   :  { %v1969_v22 = vsel %vm304_vm15, %v1965_v27, -1000000.0  ;;  %v1964_v55 = vadd.f32 %v1960_v61, %v1957_v12 }
 0x55e   :  { %v1979_v9 = vsel %vm736_vm13, %v1969_v22, -inf }
 0x55f   :  { %1980 = vmax.xlane.f32.xlu1 %v1979_v9  ;;  %v1968_v13 = vsel %vm303_vm0, %v1964_v55, -1000000.0  ;;  %v2247_v55 = vmul.f32 %v2944_v16, %v3709_v28 }
 0x560   :  { %v1976_v40 = vsel %vm736_vm13, %v1968_v13, -inf }
 0x561   :  { %1977 = vmax.xlane.f32.xlu0 %v1976_v40 }
 0x570   :  { %2404 = vrot.lane.b32.xlu1 %v3713_v34, %s3510_s20 }
 0x574   :  { %2402 = vrot.lane.b32.xlu1 %v3715_v36, %s3510_s20 }
 0x577   :  { %2093 = vrot.lane.b32.xlu0 %v3723_v41, %s3509_s14 }
 0x578   :  { %2398 = vrot.lane.b32.xlu1 %v3721_v39, %s3511_s21 }
 0x57b   :  { %2495 = vrot.lane.b32.xlu0 %v3718_v38, %s3510_s20 }
 0x57c   :  { %2400 = vrot.lane.b32.xlu1 %v3760_v50, %s3511_s21  ;;  %v2943_v50 = vld [vmem:[%s4215_s8 + $0x3] ss:$0 sm:$0xff]  ;;  %s2940_s8 = sld [smem:[#allocation11 + $0x3]] }
 0x57d   :  { %v2245_v51 = vmul.f32 %v2943_v50, %v3682_v21 }
 0x57f   :  { %2493 = vrot.lane.b32.xlu0 %v3723_v41, %s3510_s20 }
 0x580   :  { %2720 = vrot.lane.b32.xlu1 %v3718_v38, %s3512_s22 }
 0x582   :  { %v2216_v24 = vstv %s2940_s8 }
 0x583   :  { %2489 = vrot.lane.b32.xlu0 %v3730_v42, %s3511_s21  ;;  %v2244_v42 = vmul.f32 %v2943_v50, %v3670_v19  ;;  %v2218_v28 = vsub.f32 %v3790_v60, %v2216_v24  ;;  %v2217_v40 = vsub.f32 %v3792_v62, %v2216_v24 }
 0x587   :  { %2491 = vrot.lane.b32.xlu0 %v3767_v52, %s3511_s21 }
 0x58b   :  { %2633 = vrot.lane.b32.xlu0 %v3713_v34, %s3512_s22 }
 0x5d5   :  { %v1975_v12 = vpop.xlane.xlu0 %1974 }
 0x5d6   :  { %v1983_v9 = vsub.f32 %v1967_v29, %v1975_v12  ;;  %v2222_v12 = vmul.f32 %v2218_v28, %v2218_v28 }
 0x5d7   :  { %v1972_v39 = vpop.xlane.xlu1 %1971 }
 0x5d8   :  { %v1982_v27 = vsub.f32 %v1966_v35, %v1972_v39  ;;  %v1988_v57 = vmul.f32 1.442695, %v1983_v9  ;;  %v2225_v39 = vstv %s2941_s1 }
 0x5da   :  { %v1986_v61 = vmul.f32 1.442695, %v1982_v27  ;;  %v2221_v27 = vmul.f32 %v2217_v40, %v2217_v40 }
 0x5dc   :  { %3292 = vpow2.f32 %v1986_v61  ;;  %v2227_v61 = vmul.f32 %v2225_v39, %v2222_v12  ;;  %v2226_v50 = vmul.f32 %v2225_v39, %v2221_v27 }
 0x5dd   :  { %3294 = vpow2.f32 %v1988_v57 }
 0x5e8   :  { %v1981_v38 = vpop.xlane.xlu1 %1980 }
 0x5e9   :  { %v4060_v44 = vpop.eup %3292  ;;  %v1985_v52 = vsub.f32 %v1969_v22, %v1981_v38 }
 0x5ea   :  { %v4062_v5 = vpop.eup %3294  ;;  %v1978_v34 = vpop.xlane.xlu0 %1977  ;;  %3195 = vmatprep.mubr.msk.f32.mxu0 %vm736_vm13, %v4060_v44 }
 0x5eb   :  { %v1984_v29 = vsub.f32 %v1968_v13, %v1978_v34  ;;  %3196 = vmatmul.mubr.msk.f32.vlgmr.msra.gmra.mxu0 %vm736_vm13, %v4062_v5  ;;  %v1992_v35 = vmul.f32 1.442695, %v1985_v52  ;;  %v2584_v52 = vstv %s2942_s26  ;;  %v2230_v34 = vmax.f32 %v2226_v50, -13.815511 }
 0x5ec   :  { %3206 = vmatpush3.xpose.msk.msra.mxu0 %vm3626_vm1, %v4232_v59  ;;  %v2405_v47 = vpop.permute.xlu1 %2404  ;;  %3209 = vmatprep.mubr.f32.mxu0 %v2244_v42  ;;  %v2231_v42 = vmax.f32 %v2227_v61, -13.815511  ;;  %v2586_v60 = vmul.f32 %v3808_v32, %v2584_v52  ;;  %vm1583_vm1 = vcmask 130112  }
 0x5ed   :  { %v1990_v19 = vmul.f32 1.442695, %v1984_v29  ;;  %3207 = vmatprep.subr.msk.mxu0 %vm3652_vm2, %v4232_v59 }
 0x5ee   :  { %v2094_v48 = vpop.permute.xlu0 %2093 }
 0x5ef   :  { %3296 = vpow2.f32 %v1990_v19  ;;  %3200 = vmatprep.subr.mxu1 %v2094_v48  ;;  %v2585_v19 = vmul.f32 %v3814_v43, %v2584_v52  ;;  %v1372_v52 = vsel %vm736_vm13, %v3960_v31, 0.0 }
 0x5f0   :  { %3298 = vpow2.f32 %v1992_v35  ;;  %3201 = vmatpush3.msra.mxu1 %v2094_v48  ;;  %3208 = vmatpush3.xpose.msk.msra.mxu0 %vm3652_vm2, %v4232_v59  ;;  %v2403_v10 = vpop.permute.xlu1 %2402  ;;  %v2220_v48 = vsub.f32 %v3795_v0, %v2216_v24  ;;  %vm2208_vm2 = vcmask 195712  }
 0x5f1   :  { %3219 = vmatprep.subr.msk.mxu0 %vm544_vm9, %v2405_v47  ;;  %3212 = vmatprep.subr.msk.mxu1 %vm3657_vm3, %v4232_v59 }
 0x5f2   :  { %v2496_v54 = vpop.permute.xlu0 %2495  ;;  %v2224_v32 = vmul.f32 %v2220_v48, %v2220_v48 }
 0x5f3   :  { %3210 = vmatmul.mubr.f32.vlgmr.msra.gmra.mxu0 %v2245_v51 }
 0x5f4   :  { %3220 = vmatpush3.xpose.msk.msra.mxu0 %vm544_vm9, %v2405_v47  ;;  %v2399_v18 = vpop.permute.xlu1 %2398 }
 0x5f5   :  { %3221 = vmatprep.subr.msk.mxu0 %vm544_vm9, %v2403_v10  ;;  %3223 = vmatprep.mubr.msk.f32.mxu0 %vm544_vm9, %v2399_v18 }
 0x5f6   :  { %v2494_v21 = vpop.permute.xlu0 %2493 }
 0x5f8   :  { %3222 = vmatpush3.xpose.msk.msra.mxu0 %vm544_vm9, %v2403_v10  ;;  %v2401_v49 = vpop.permute.xlu1 %2400 }
 0x5fa   :  { %v2490_v7 = vpop.permute.xlu0 %2489 }
 0x5fb   :  { %3224 = vmatmul.mubr.msk.f32.vlgmr.msra.gmra.mxu0 %vm544_vm9, %v2401_v49 }
 0x5fc   :  { %v4091_v4 = vpop.eup %3296  ;;  %v2721_v17 = vpop.permute.xlu1 %2720 }
 0x5fd   :  { %v4093_v2 = vpop.eup %3298  ;;  %3202 = vmatprep.mubr.msk.f32.mxu1 %vm736_vm13, %v4091_v4  ;;  %v2000_v31 = vsel %vm736_vm13, %v4091_v4, 0.0 }
 0x5fe   :  { %v2492_v22 = vpop.permute.xlu0 %2491  ;;  %3203 = vmatmul.mubr.msk.f32.vlgmr.msra.gmra.mxu1 %vm736_vm13, %v4093_v2  ;;  %v2003_v56 = vsel %vm736_vm13, %v4093_v2, 0.0 }
 0x5ff   :  { %3213 = vmatpush3.xpose.msk.msra.mxu1 %vm3657_vm3, %v4232_v59  ;;  %3216 = vmatprep.mubr.f32.mxu1 %v2246_v20  ;;  %vm2833_vm3 = vcmask 261312  }
 0x600   :  { %3214 = vmatprep.subr.msk.mxu1 %vm3687_vm6, %v4232_v59 }
 0x602   :  { %v2634_v26 = vpop.permute.xlu0 %2633 }
 0x603   :  { %3215 = vmatpush3.xpose.msk.msra.mxu1 %vm3687_vm6, %v4232_v59  ;;  %3233 = vmatprep.subr.mxu0 %v2634_v26 }
 0x604   :  { %3226 = vmatprep.subr.msk.mxu1 %vm544_vm9, %v2496_v54  ;;  %3234 = vmatpush3.msra.mxu0 %v2634_v26 }
 0x606   :  { %3217 = vmatmul.mubr.f32.vlgmr.msra.gmra.mxu1 %v2247_v55 }
 0x607   :  { %3227 = vmatpush3.xpose.msk.msra.mxu1 %vm544_vm9, %v2496_v54  ;;  %3230 = vmatprep.mubr.msk.f32.mxu1 %vm544_vm9, %v2490_v7  ;;  %v2219_v54 = vsub.f32 %v3798_v3, %v2216_v24  ;;  %v2229_v3 = vmul.f32 %v2225_v39, %v2224_v32 }
 0x608   :  { %3228 = vmatprep.subr.msk.mxu1 %vm544_vm9, %v2494_v21 }
 0x609   :  { %v2223_v0 = vmul.f32 %v2219_v54, %v2219_v54  ;;  %v2233_v55 = vmax.f32 %v2229_v3, -13.815511  ;;  %v770_v3 = vsel %vm736_vm13, %v3884_v15, 0.0 }
 0x60b   :  { %3229 = vmatpush3.xpose.msk.msra.mxu1 %vm544_vm9, %v2494_v21  ;;  %v2228_v26 = vmul.f32 %v2225_v39, %v2223_v0  ;;  %v761_v0 = vsel %vm736_vm13, %v3868_v1, 0.0 }
 0x60c   :  { %3240 = vmatprep.subr.mxu1 %v2721_v17 }
 0x60e   :  { %3231 = vmatmul.mubr.msk.f32.vlgmr.msra.gmra.mxu1 %vm544_vm9, %v2492_v22 }
 0x60f   :  { %3241 = vmatpush3.msra.mxu1 %v2721_v17  ;;  %v2232_v17 = vmax.f32 %v2228_v26, -13.815511 }
 0x6ab   :  { %v4116_v13 = vpop.f32.mrf.mxu0 }
 0x6ad   :  { %v4119_v9 = vpop.f32.mrf.mxu0 }
 0x6b3   :  { %v3211_v57 = vpop.f32.mrf.mxu0 }
 0x6b5   :  { %v2314_v38 = vpop.f32.mrf.mxu0 }
 0x6bb   :  { %v3225_v29 = vpop.f32.mrf.mxu0 }
 0x6bc   :  { %v2486_v35 = vadd.f32 %v3225_v29, %v2231_v42 }
 0x6bd   :  { %v2480_v59 = vpop.f32.mrf.mxu0 }
 0x6be   :  { %v2581_v47 = vadd.f32 %v3211_v57, %v2486_v35  ;;  %v2481_v62 = vadd.f32 %v2480_v59, %v2230_v34  ;;  %v4125_v18 = vpop.f32.mrf.mxu1  ;;  %v1375_v34 = vsel %vm736_vm13, %v3989_v30, 0.0 }
 0x6c0   :  { %v2580_v51 = vadd.f32 %v2481_v62, %v2314_v38  ;;  %v2588_v10 = vadd.f32 %v2586_v60, %v2581_v47  ;;  %v4133_v20 = vpop.f32.mrf.mxu1 }
 0x6c2   :  { %v2592_v21 = vsel %vm302_vm12, %v2588_v10, -1000000.0  ;;  %v2587_v16 = vadd.f32 %v2585_v19, %v2580_v51 }
 0x6c3   :  { %v2598_v49 = vsel %vm736_vm13, %v2592_v21, -inf }
 0x6c4   :  { %2599 = vmax.xlane.f32.xlu0 %v2598_v49  ;;  %v2591_v7 = vsel %vm301_vm14, %v2587_v16, -1000000.0 }
 0x6c5   :  { %v2595_v43 = vsel %vm736_vm13, %v2591_v7, -inf }
 0x6c6   :  { %2596 = vmax.xlane.f32.xlu1 %v2595_v43  ;;  %v3218_v22 = vpop.f32.mrf.mxu1  ;;  %v764_v43 = vsel %vm736_vm13, %v3873_v6, 0.0 }
 0x6c8   :  { %v2389_v37 = vpop.f32.mrf.mxu1 }
 0x6ce   :  { %v3232_v24 = vpop.f32.mrf.mxu1 }
 0x6cf   :  { %v2577_v28 = vadd.f32 %v3232_v24, %v2233_v55 }
 0x6d0   :  { %v2571_v40 = vpop.f32.mrf.mxu1 }
 0x6d1   :  { %v2583_v12 = vadd.f32 %v3218_v22, %v2577_v28  ;;  %v2572_v27 = vadd.f32 %v2571_v40, %v2232_v17  ;;  %v767_v22 = vsel %vm736_vm13, %v3882_v14, 0.0 }
 0x6d3   :  { %v2582_v57 = vadd.f32 %v2572_v27, %v2389_v37  ;;  %v2590_v46 = vadd.f32 %v2586_v60, %v2583_v12 }
 0x6d5   :  { %v2594_v61 = vsel %vm304_vm15, %v2590_v46, -1000000.0  ;;  %v2589_v50 = vadd.f32 %v2585_v19, %v2582_v57 }
 0x6d6   :  { %v2604_v38 = vsel %vm736_vm13, %v2594_v61, -inf }
 0x6d7   :  { %2605 = vmax.xlane.f32.xlu1 %v2604_v38  ;;  %v2593_v39 = vsel %vm303_vm0, %v2589_v50, -1000000.0 }
 0x6d8   :  { %v2601_v42 = vsel %vm736_vm13, %v2593_v39, -inf }
 0x6d9   :  { %2602 = vmax.xlane.f32.xlu0 %v2601_v42 }
 0x6e8   :  { %2631 = vrot.lane.b32.xlu1 %v3715_v36, %s3512_s22  ;;  %v1997_v36 = vsel %vm736_vm13, %v4062_v5, 0.0 }
 0x6ef   :  { %2718 = vrot.lane.b32.xlu0 %v3723_v41, %s3512_s22  ;;  %v1994_v41 = vsel %vm736_vm13, %v4060_v44, 0.0 }
 0x70c   :  { %1370 = vadd.xlane.f32.xlu1 %v1369_v53 }
 0x70e   :  { %1373 = vadd.xlane.f32.xlu0 %v1372_v52 }
 0x710   :  { %1379 = vadd.xlane.f32.xlu1 %v1378_v11 }
 0x712   :  { %1376 = vadd.xlane.f32.xlu0 %v1375_v34 }
 0x714   :  { %1998 = vadd.xlane.f32.xlu1 %v1997_v36 }
 0x716   :  { %1995 = vadd.xlane.f32.xlu0 %v1994_v41 }
 0x718   :  { %2004 = vadd.xlane.f32.xlu1 %v2003_v56 }
 0x71a   :  { %2001 = vadd.xlane.f32.xlu0 %v2000_v31 }
 0x74d   :  { %v2600_v63 = vpop.xlane.xlu0 %2599 }
 0x74e   :  { %v2608_v29 = vsub.f32 %v2592_v21, %v2600_v63 }
 0x74f   :  { %v2597_v30 = vpop.xlane.xlu1 %2596 }
 0x750   :  { %v2613_v35 = vmul.f32 1.442695, %v2608_v29  ;;  %v2607_v60 = vsub.f32 %v2591_v7, %v2597_v30  ;;  %v4233_v29 = vld [vmem:[#allocation22_spill] sm:$0xff] }
 0x752   :  { %3300 = vpow2.f32 %v2613_v35  ;;  %v2611_v5 = vmul.f32 1.442695, %v2607_v60  ;;  %v4234_v60 = vld [vmem:[#allocation23_spill] sm:$0xff] }
 0x754   :  { %3302 = vpow2.f32 %v2611_v5 }
 0x75f   :  { %v3301_v59 = vpop.eup %3300 }
 0x760   :  { %v2606_v47 = vpop.xlane.xlu1 %2605  ;;  %v2622_v44 = vsel %vm736_vm13, %v3301_v59, 0.0 }
 0x761   :  { %v3303_v62 = vpop.eup %3302  ;;  %v2610_v19 = vsub.f32 %v2594_v61, %v2606_v47  ;;  %2623 = vadd.xlane.f32.xlu1 %v2622_v44 }
 0x762   :  { %v2603_v2 = vpop.xlane.xlu0 %2602  ;;  %3237 = vmatprep.mubr.msk.f32.mxu0 %vm736_vm13, %v3303_v62  ;;  %v2619_v4 = vsel %vm736_vm13, %v3303_v62, 0.0 }
 0x763   :  { %v2617_v48 = vmul.f32 1.442695, %v2610_v19  ;;  %v2609_v51 = vsub.f32 %v2593_v39, %v2603_v2  ;;  %2620 = vadd.xlane.f32.xlu0 %v2619_v4 }
 0x764   :  { %v2632_v10 = vpop.permute.xlu1 %2631 }
 0x765   :  { %3304 = vpow2.f32 %v2617_v48  ;;  %v2615_v54 = vmul.f32 1.442695, %v2609_v51  ;;  %3235 = vmatprep.subr.mxu0 %v2632_v10 }
 0x766   :  { %v2719_v21 = vpop.permute.xlu0 %2718  ;;  %3236 = vmatpush3.msra.mxu0 %v2632_v10 }
 0x767   :  { %3306 = vpow2.f32 %v2615_v54  ;;  %3238 = vmatmul.mubr.msk.f32.vlgmr.msra.gmra.mxu0 %vm736_vm13, %v3301_v59  ;;  %3242 = vmatprep.subr.mxu1 %v2719_v21 }
 0x768   :  { %3243 = vmatpush3.msra.mxu1 %v2719_v21 }
 0x772   :  { %v3305_v16 = vpop.eup %3304 }
 0x773   :  { %v2628_v49 = vsel %vm736_vm13, %v3305_v16, 0.0 }
 0x774   :  { %v3307_v32 = vpop.eup %3306  ;;  %2629 = vadd.xlane.f32.xlu1 %v2628_v49 }
 0x775   :  { %3244 = vmatprep.mubr.msk.f32.mxu1 %vm736_vm13, %v3307_v32  ;;  %v2625_v7 = vsel %vm736_vm13, %v3307_v32, 0.0 }
 0x776   :  { %2626 = vadd.xlane.f32.xlu0 %v2625_v7  ;;  %3245 = vmatmul.mubr.msk.f32.vlgmr.msra.gmra.mxu1 %vm736_vm13, %v3305_v16 }
 0x778   :  { %765 = vadd.xlane.f32.xlu1 %v764_v43 }
 0x77a   :  { %762 = vadd.xlane.f32.xlu0 %v761_v0 }
 0x77c   :  { %771 = vadd.xlane.f32.xlu1 %v770_v3 }
 0x77e   :  { %768 = vadd.xlane.f32.xlu0 %v767_v22 }
 0x795   :  { %v1371_v26 = vpop.xlane.xlu1 %1370 }
 0x796   :  { %3308 = vrcp.f32 %v1371_v26 }
 0x797   :  { %v1374_v55 = vpop.xlane.xlu0 %1373 }
 0x798   :  { %3310 = vrcp.f32 %v1374_v55 }
 0x799   :  { %v1380_v37 = vpop.xlane.xlu1 %1379 }
 0x79a   :  { %3312 = vrcp.f32 %v1380_v37 }
 0x79b   :  { %v1377_v6 = vpop.xlane.xlu0 %1376 }
 0x79c   :  { %3314 = vrcp.f32 %v1377_v6 }
 0x79d   :  { %v1999_v17 = vpop.xlane.xlu1 %1998 }
 0x79e   :  { %3316 = vrcp.f32 %v1999_v17 }
 0x79f   :  { %v1996_v1 = vpop.xlane.xlu0 %1995 }
 0x7a0   :  { %3318 = vrcp.f32 %v1996_v1 }
 0x7a1   :  { %v2005_v24 = vpop.xlane.xlu1 %2004 }
 0x7a2   :  { %3320 = vrcp.f32 %v2005_v24 }
 0x7a3   :  { %v3309_v15 = vpop.eup %3308  ;;  %v2002_v28 = vpop.xlane.xlu0 %2001 }
 0x7a4   :  { %3322 = vrcp.f32 %v2002_v28  ;;  %v1563_v14 = vmul.f32 %v3309_v15, %v4020_v33 }
 0x7a5   :  { %v3311_v40 = vpop.eup %3310 }
 0x7a6   :  { %1571 = vrot.lane.b32.xlu0 %v1563_v14, %s3492_s16  ;;  %v1564_v12 = vmul.f32 %v3311_v40, %v4017_v23 }
 0x7a7   :  { %v3313_v27 = vpop.eup %3312 }
 0x7a8   :  { %1573 = vrot.lane.b32.xlu1 %v1564_v12, %s3492_s16  ;;  %v1566_v57 = vmul.f32 %v3313_v27, %v4026_v25 }
 0x7a9   :  { %v3315_v46 = vpop.eup %3314 }
 0x7aa   :  { %1577 = vrot.lane.b32.xlu0 %v1566_v57, %s3492_s16  ;;  %v1565_v61 = vmul.f32 %v3315_v46, %v4034_v8 }
 0x7ab   :  { %v3317_v50 = vpop.eup %3316 }
 0x7ac   :  { %1575 = vrot.lane.b32.xlu1 %v1565_v61, %s3492_s16  ;;  %v2189_v33 = vmul.f32 %v3317_v50, %v4116_v13 }
 0x7ad   :  { %v3319_v38 = vpop.eup %3318 }
 0x7ae   :  { %2198 = vrot.lane.b32.xlu0 %v2189_v33, %s3495_s29  ;;  %v2188_v23 = vmul.f32 %v3319_v38, %v4119_v9 }
 0x7af   :  { %v3321_v39 = vpop.eup %3320 }
 0x7b0   :  { %2196 = vrot.lane.b32.xlu1 %v2188_v23, %s3495_s29  ;;  %v2191_v25 = vmul.f32 %v3321_v39, %v4125_v18 }
 0x7b1   :  { %v3323_v42 = vpop.eup %3322 }
 0x7b2   :  { %2202 = vrot.lane.b32.xlu0 %v2191_v25, %s3495_s29  ;;  %v2190_v8 = vmul.f32 %v3323_v42, %v4133_v20 }
 0x7b4   :  { %2200 = vrot.lane.b32.xlu1 %v2190_v8, %s3495_s29  ;;  %s3513_s29 = smov 24  }
 0x7ea   :  { %v2624_v53 = vpop.xlane.xlu1 %2623 }
 0x7ec   :  { %v2621_v52 = vpop.xlane.xlu0 %2620 }
 0x7fd   :  { %v2630_v13 = vpop.xlane.xlu1 %2629 }
 0x7ff   :  { %v2627_v11 = vpop.xlane.xlu0 %2626 }
 0x801   :  { %v766_v34 = vpop.xlane.xlu1 %765 }
 0x802   :  { %3324 = vrcp.f32 %v766_v34 }
 0x803   :  { %v763_v36 = vpop.xlane.xlu0 %762 }
 0x804   :  { %3326 = vrcp.f32 %v763_v36 }
 0x805   :  { %v772_v9 = vpop.xlane.xlu1 %771 }
 0x806   :  { %3328 = vrcp.f32 %v772_v9 }
 0x807   :  { %v769_v41 = vpop.xlane.xlu0 %768 }
 0x808   :  { %3330 = vrcp.f32 %v769_v41 }
 0x809   :  { %3332 = vrcp.f32 %v2624_v53 }
 0x80a   :  { %3334 = vrcp.f32 %v2621_v52 }
 0x80b   :  { %3336 = vrcp.f32 %v2630_v13 }
 0x80c   :  { %3338 = vrcp.f32 %v2627_v11 }
 0x80f   :  { %v3325_v18 = vpop.eup %3324 }
 0x810   :  { %v956_v56 = vmul.f32 %v3325_v18, %v3914_v45 }
 0x811   :  { %v3327_v31 = vpop.eup %3326 }
 0x812   :  { %v955_v20 = vmul.f32 %v3327_v31, %v3917_v58  ;;  %960 = vst.msk [vmem:[#allocation15 + $0x8] sm:$0xff] %vm544_vm9, %v956_v56 }
 0x813   :  { %v3329_v63 = vpop.eup %3328 }
 0x814   :  { %959 = vst.msk [vmem:[#allocation15] sm:$0xff] %vm544_vm9, %v955_v20  ;;  %v958_v30 = vmul.f32 %v3329_v63, %v4233_v29 }
 0x815   :  { %v3331_v35 = vpop.eup %3330 }
 0x816   :  { %962 = vst.msk [vmem:[#allocation15 + $0x18] sm:$0xff] %vm544_vm9, %v958_v30  ;;  %v957_v5 = vmul.f32 %v3331_v35, %v4234_v60  ;;  %v3333_v4 = vpop.eup %3332 }
 0x817   :  { %v3335_v10 = vpop.eup %3334 }
 0x818   :  { %v1572_v59 = vpop.permute.xlu0 %1571  ;;  %961 = vst.msk [vmem:[#allocation15 + $0x10] sm:$0xff] %vm544_vm9, %v957_v5  ;;  %v3337_v16 = vpop.eup %3336 }
 0x819   :  { %1584 = vst.msk [vmem:[#allocation15] sm:$0xff] %vm1583_vm1, %v1572_v59  ;;  %v3339_v7 = vpop.eup %3338 }
 0x81a   :  { %v1574_v45 = vpop.permute.xlu1 %1573 }
 0x81b   :  { %1585 = vst.msk [vmem:[#allocation15 + $0x8] sm:$0xff] %vm1583_vm1, %v1574_v45 }
 0x81c   :  { %v1578_v58 = vpop.permute.xlu0 %1577 }
 0x81d   :  { %1587 = vst.msk [vmem:[#allocation15 + $0x18] sm:$0xff] %vm1583_vm1, %v1578_v58 }
 0x81e   :  { %v1576_v47 = vpop.permute.xlu1 %1575 }
 0x81f   :  { %1586 = vst.msk [vmem:[#allocation15 + $0x10] sm:$0xff] %vm1583_vm1, %v1576_v47 }
 0x820   :  { %v2199_v44 = vpop.permute.xlu0 %2198 }
 0x821   :  { %2210 = vst.msk [vmem:[#allocation15 + $0x8] sm:$0xff] %vm2208_vm2, %v2199_v44 }
 0x822   :  { %v2197_v62 = vpop.permute.xlu1 %2196 }
 0x823   :  { %2209 = vst.msk [vmem:[#allocation15] sm:$0xff] %vm2208_vm2, %v2197_v62 }
 0x824   :  { %v2203_v19 = vpop.permute.xlu0 %2202 }
 0x825   :  { %2212 = vst.msk [vmem:[#allocation15 + $0x18] sm:$0xff] %vm2208_vm2, %v2203_v19 }
 0x826   :  { %v2201_v2 = vpop.permute.xlu1 %2200 }
 0x827   :  { %2211 = vst.msk [vmem:[#allocation15 + $0x10] sm:$0xff] %vm2208_vm2, %v2201_v2  ;;  %v3239_v48 = vpop.f32.mrf.mxu0 }
 0x828   :  { %v2814_v51 = vmul.f32 %v3333_v4, %v3239_v48 }
 0x829   :  { %v2709_v54 = vpop.f32.mrf.mxu0 }
 0x82a   :  { %v2813_v21 = vmul.f32 %v3335_v10, %v2709_v54  ;;  %2823 = vrot.lane.b32.xlu0 %v2814_v51, %s3513_s29 }
 0x82c   :  { %2821 = vrot.lane.b32.xlu1 %v2813_v21, %s3513_s29 }
 0x836   :  { %v3246_v49 = vpop.f32.mrf.mxu1 }
 0x837   :  { %v2816_v32 = vmul.f32 %v3337_v16, %v3246_v49 }
 0x838   :  { %v2796_v43 = vpop.f32.mrf.mxu1 }
 0x839   :  { %v2815_v0 = vmul.f32 %v3339_v7, %v2796_v43  ;;  %2827 = vrot.lane.b32.xlu0 %v2816_v32, %s3513_s29 }
 0x83b   :  { %2825 = vrot.lane.b32.xlu1 %v2815_v0, %s3513_s29 }
 0x89c   :  { %v2824_v3 = vpop.permute.xlu0 %2823 }
 0x89d   :  { %2835 = vst.msk [vmem:[#allocation15 + $0x8] sm:$0xff] %vm2833_vm3, %v2824_v3 }
 0x89e   :  { %v2822_v22 = vpop.permute.xlu1 %2821 }
 0x89f   :  { %2834 = vst.msk [vmem:[#allocation15] sm:$0xff] %vm2833_vm3, %v2822_v22 }
 0x8ab   :  { %v2828_v26 = vpop.permute.xlu0 %2827 }
 0x8ac   :  { %2837 = vst.msk [vmem:[#allocation15 + $0x18] sm:$0xff] %vm2833_vm3, %v2828_v26 }
 0x8ad   :  { %v2826_v55 = vpop.permute.xlu1 %2825 }
 0x8ae   :  { %2836 = vst.msk [vmem:[#allocation15 + $0x10] sm:$0xff] %vm2833_vm3, %v2826_v55 }
 0x8af   :  { %3467 = shalt.err (!%p3464_p11)
}
 0x8b0   :  { %2849 = dma.vmem_to_hbm [thread:$0]  %s2844_s28, 512, %s4219_s12, [#allocation4], %s3491_s2, %s3491_s2, %s3492_s16  }
 0x8b1   :  { %3486 = dma.done.wait [#allocation4], 512  }
 0x8b2   :  { %3487 = vsyncadd [#allocation4], 4294966784 }
 0x8b3   :  { %2853 = vsyncpa [#allocation3], 1 }
 0x8b4   :  { %2854 = vsyncpa [#allocation7], 1 }
 0x8b5   :  { %2855 = vsyncpa [#allocation10], 1 }
 0x8b6   :  { %2856 = vsyncpa [#allocation4], 1 }
 0x8b7   :  { %2857 = vsyncpa [#allocation5], 1 }
 0x8b8   :  { %2858 = vsyncpa [#allocation13], 1 }

</bundles_post_ra>
